<compile_context>
chip_gen: v6e
topology: v6e:2x2x1
jax: 0.10.0
libtpu: 0.0.40
codegen_flags: <defaults>
</compile_context>

<pallas_src>
from functools import partial

import jax
import jax.numpy as jnp
from jax.experimental import pallas as pl
from jax.experimental.pallas import tpu as pltpu


def _pool_kernel(x_ref, selh_ref, m_ref, b_ref, cls_ref, fcw_ref, fcb_ref,
                 xo_ref, co_ref, *, C_in, mult, K, HO, WO):
    """One batch element per grid step: depthwise conv + fused cls-token FC.

    x_ref   : VMEM (1, C_in, H, W)        raw NCHW activation tile
    selh_ref: VMEM (K, HO, H)             0/1 row-selection (stride + pad folded in)
    m_ref   : VMEM (C_out, K, W, WO)      column-selection * filter taps, per out chan
    b_ref   : SMEM (C_out,)               conv bias
    cls_ref : VMEM (1, T, C_in)           cls token
    fcw_ref : VMEM (C_in, C_out)          fc weight (pre-transposed)
    fcb_ref : VMEM (1, C_out)             fc bias
    xo_ref  : VMEM (1, C_out, HO, WO)     conv output, already NCHW
    co_ref  : VMEM (1, T, C_out)          fc output
    """
    f32 = jnp.float32
    for c in range(C_in):                              # input channel (= group)
        xc = x_ref[0, c].astype(f32)                   # (H, W), W on lanes
        # Row selection (stride-S rows + zero padding folded into SelH); shared
        # by all `mult` output channels of this group -> x[c] is read once.
        rows = [jnp.dot(selh_ref[kh], xc, preferred_element_type=f32)
                for kh in range(K)]                    # K x (HO, W)
        for m in range(mult):
            o = c * mult + m                           # output channel index
            acc = jnp.full((HO, WO), b_ref[o], dtype=f32)
            for kh in range(K):
                # M[o, kh] folds the kw taps, stride-S column selection and the
                # zero padding for this output channel into one (W, WO) matrix.
                acc = acc + jnp.dot(rows[kh], m_ref[o, kh],
                                    preferred_element_type=f32)
            # Single dense (HO, WO) store straight into the NCHW output block.
            xo_ref[0, o] = acc.astype(xo_ref.dtype)

    # Fused cls-token FC: (T, C_in) @ (C_in, C_out) + bias.
    y = jnp.dot(cls_ref[0].astype(f32), fcw_ref[...].astype(f32),
                preferred_element_type=f32) + fcb_ref[...].astype(f32)
    co_ref[0] = y.astype(co_ref.dtype)


def conv_head_pooling_forward(params, x, cls_token, *, stride):
    """params: conv_w (C_out,K,K), conv_b (C_out,), fc_w (C_out,C_in), fc_b (C_out,)."""
    conv_w = params["conv_w"]
    conv_b = params["conv_b"]
    fc_w = params["fc_w"]
    fc_b = params["fc_b"]

    N, C_in, H, W = x.shape
    C_out, K, _ = conv_w.shape
    S = stride
    pad = S // 2
    assert C_out % C_in == 0
    mult = C_out // C_in
    HO = (H + 2 * pad - K) // S + 1
    WO = (W + 2 * pad - K) // S + 1
    B, T, _ = cls_token.shape
    assert B == N

    # ---- tiny weight-only transforms (no activation re-layout in XLA) -------
    # SelH[kh, i, h] = 1  iff  h == S*i + kh - pad                 -> (K, HO, H)
    i_idx = jnp.arange(HO)[None, :, None]
    h_idx = jnp.arange(H)[None, None, :]
    kh_idx = jnp.arange(K)[:, None, None]
    selh = (h_idx == S * i_idx + kh_idx - pad).astype(jnp.float32)
    # SelW[kw, w, j] = 1  iff  w == S*j + kw - pad                 -> (K, W, WO)
    j_idx = jnp.arange(WO)[None, None, :]
    w_idx = jnp.arange(W)[None, :, None]
    kw_idx = jnp.arange(K)[:, None, None]
    selw = (w_idx == S * j_idx + kw_idx - pad).astype(jnp.float32)
    # M[o, kh, w, j] = conv_w[o, kh, kw] where w == S*j + kw - pad (exact: at
    # most one kw contributes per (w, j)).                 -> (C_out, K, W, WO)
    m_mat = (conv_w[:, :, :, None, None] * selw[None, None]).sum(axis=2)
    fc_wt = jnp.transpose(fc_w)                                  # (C_in, C_out)

    kernel = partial(_pool_kernel, C_in=C_in, mult=mult, K=K, HO=HO, WO=WO)

    x_out, cls_out = pl.pallas_call(
        kernel,
        out_shape=(
            jax.ShapeDtypeStruct((N, C_out, HO, WO), x.dtype),
            jax.ShapeDtypeStruct((B, T, C_out), cls_token.dtype),
        ),
        grid=(N,),
        in_specs=[
            pl.BlockSpec((1, C_in, H, W), lambda n: (n, 0, 0, 0)),
            pl.BlockSpec((K, HO, H), lambda n: (0, 0, 0)),
            pl.BlockSpec((C_out, K, W, WO), lambda n: (0, 0, 0, 0)),
            pl.BlockSpec(memory_space=pltpu.MemorySpace.SMEM),
            pl.BlockSpec((1, T, C_in), lambda n: (n, 0, 0)),
            pl.BlockSpec((C_in, C_out), lambda n: (0, 0)),
            pl.BlockSpec((1, C_out), lambda n: (0, 0)),
        ],
        out_specs=(
            pl.BlockSpec((1, C_out, HO, WO), lambda n: (n, 0, 0, 0)),
            pl.BlockSpec((1, T, C_out), lambda n: (n, 0, 0)),
        ),
        compiler_params=pltpu.CompilerParams(
            dimension_semantics=("parallel",)),
    )(x, selh, m_mat, conv_b, cls_token, fc_wt, fc_b.reshape(1, C_out))

    # Output is already NCHW -- nothing to reshape or transpose.
    return x_out, cls_out


if __name__ == "__main__":
    # conv_head_pooling(in_feature=4, out_feature=8, stride=2)
    in_feature, out_feature, stride = 4, 8, 2
    K = stride + 1
    pad = stride // 2
    B, H, W = 2, 16, 16

    key = jax.random.PRNGKey(0)
    k1, k2, k3, k4, k5, k6 = jax.random.split(key, 6)

    params = {
        # torch Conv2d weight is (out, in/groups=1, K, K); singleton dim dropped.
        "conv_w": 0.1 * jax.random.normal(k1, (out_feature, K, K), jnp.float32),
        "conv_b": 0.1 * jax.random.normal(k2, (out_feature,), jnp.float32),
        "fc_w": 0.1 * jax.random.normal(k3, (out_feature, in_feature), jnp.float32),
        "fc_b": 0.1 * jax.random.normal(k4, (out_feature,), jnp.float32),
    }

    x = jax.random.normal(k5, (B, in_feature, H, W), jnp.float32)
    cls_token = jax.random.normal(k6, (B, 1, in_feature), jnp.float32)

    x_out, cls_out = conv_head_pooling_forward(params, x, cls_token, stride=stride)
    x_out = jax.block_until_ready(x_out)
    cls_out = jax.block_until_ready(cls_out)

    # Pure-JAX reference (same semantics as the PyTorch module).
    ref_conv = jax.lax.conv_general_dilated(
        x, params["conv_w"].reshape(out_feature, 1, K, K),
        window_strides=(stride, stride),
        padding=[(pad, pad), (pad, pad)],
        feature_group_count=in_feature,
        dimension_numbers=("NCHW", "OIHW", "NCHW"),
    ) + params["conv_b"].reshape(1, -1, 1, 1)
    ref_cls = cls_token @ params["fc_w"].T + params["fc_b"]

    assert x_out.shape == ref_conv.shape and cls_out.shape == ref_cls.shape
    assert jnp.allclose(x_out, ref_conv, atol=1e-4, rtol=1e-4), \
        float(jnp.max(jnp.abs(x_out - ref_conv)))
    assert jnp.allclose(cls_out, ref_cls, atol=1e-4, rtol=1e-4), \
        float(jnp.max(jnp.abs(cls_out - ref_cls)))

    print("KERNEL_OK")
</pallas_src>

<mosaic_0001>
module attributes {stable_mosaic.version = 11 : i64} {
  func.func @_pool_kernel(%arg0: i32, %arg1: memref<1x4x16x16xf32, #tpu.memory_space<vmem>>, %arg2: memref<3x8x16xf32, #tpu.memory_space<vmem>>, %arg3: memref<8x3x16x8xf32, #tpu.memory_space<vmem>>, %arg4: memref<8xf32, #tpu.memory_space<smem>>, %arg5: memref<1x1x4xf32, #tpu.memory_space<vmem>>, %arg6: memref<4x8xf32, #tpu.memory_space<vmem>>, %arg7: memref<1x8xf32, #tpu.memory_space<vmem>>, %arg8: memref<1x8x8x8xf32, #tpu.memory_space<vmem>>, %arg9: memref<1x1x8xf32, #tpu.memory_space<vmem>>) attributes {dimension_semantics = [#tpu.dimension_semantics<parallel>], iteration_bounds = array<i64: 2>, scalar_prefetch = 0 : i64, scratch_operands = 0 : i64, tpu.core_type = #tpu.core_type<tc>, window_params = [{transform_indices = @transform_0, window_bounds = array<i64: 1, 4, 16, 16>}, {pipeline_mode = #tpu.pipeline_mode<synchronous>, transform_indices = @transform_1, window_bounds = array<i64: 3, 8, 16>}, {pipeline_mode = #tpu.pipeline_mode<synchronous>, transform_indices = @transform_2, window_bounds = array<i64: 8, 3, 16, 8>}, {transform_indices = @transform_3, window_bounds = array<i64: 8>}, {transform_indices = @transform_4, window_bounds = array<i64: 1, 1, 4>}, {pipeline_mode = #tpu.pipeline_mode<synchronous>, transform_indices = @transform_5, window_bounds = array<i64: 4, 8>}, {pipeline_mode = #tpu.pipeline_mode<synchronous>, transform_indices = @transform_6, window_bounds = array<i64: 1, 8>}, {transform_indices = @transform_7, window_bounds = array<i64: 1, 8, 8, 8>}, {transform_indices = @transform_8, window_bounds = array<i64: 1, 1, 8>}]} {
    %c0 = arith.constant 0 : index
    %c0_0 = arith.constant 0 : index
    %c0_1 = arith.constant 0 : index
    %c0_2 = arith.constant 0 : index
    %0 = vector.load %arg1[%c0, %c0_0, %c0_1, %c0_2] : memref<1x4x16x16xf32, #tpu.memory_space<vmem>>, vector<1x1x16x16xf32>
    %1 = vector.shape_cast %0 : vector<1x1x16x16xf32> to vector<16x16xf32>
    %c0_3 = arith.constant 0 : index
    %c0_4 = arith.constant 0 : index
    %c0_5 = arith.constant 0 : index
    %2 = vector.load %arg2[%c0_3, %c0_4, %c0_5] : memref<3x8x16xf32, #tpu.memory_space<vmem>>, vector<1x8x16xf32>
    %3 = vector.shape_cast %2 : vector<1x8x16xf32> to vector<8x16xf32>
    %cst = arith.constant dense<0.000000e+00> : vector<8x16xf32>
    %4 = tpu.matmul %3, %1, %cst {dimension_numbers = #tpu.dot_dimension_numbers<[1], [0], [0], [1], [0, 0, 1, 1], [], []>} : vector<8x16xf32>, vector<16x16xf32>, vector<8x16xf32> -> vector<8x16xf32>
    %c1 = arith.constant 1 : index
    %c0_6 = arith.constant 0 : index
    %c0_7 = arith.constant 0 : index
    %5 = vector.load %arg2[%c1, %c0_6, %c0_7] : memref<3x8x16xf32, #tpu.memory_space<vmem>>, vector<1x8x16xf32>
    %6 = vector.shape_cast %5 : vector<1x8x16xf32> to vector<8x16xf32>
    %cst_8 = arith.constant dense<0.000000e+00> : vector<8x16xf32>
    %7 = tpu.matmul %6, %1, %cst_8 {dimension_numbers = #tpu.dot_dimension_numbers<[1], [0], [0], [1], [0, 0, 1, 1], [], []>} : vector<8x16xf32>, vector<16x16xf32>, vector<8x16xf32> -> vector<8x16xf32>
    %c2 = arith.constant 2 : index
    %c0_9 = arith.constant 0 : index
    %c0_10 = arith.constant 0 : index
    %8 = vector.load %arg2[%c2, %c0_9, %c0_10] : memref<3x8x16xf32, #tpu.memory_space<vmem>>, vector<1x8x16xf32>
    %9 = vector.shape_cast %8 : vector<1x8x16xf32> to vector<8x16xf32>
    %cst_11 = arith.constant dense<0.000000e+00> : vector<8x16xf32>
    %10 = tpu.matmul %9, %1, %cst_11 {dimension_numbers = #tpu.dot_dimension_numbers<[1], [0], [0], [1], [0, 0, 1, 1], [], []>} : vector<8x16xf32>, vector<16x16xf32>, vector<8x16xf32> -> vector<8x16xf32>
    %c0_12 = arith.constant 0 : index
    %11 = memref.load %arg4[%c0_12] : memref<8xf32, #tpu.memory_space<smem>>
    %12 = vector.broadcast %11 : f32 to vector<8x8xf32>
    %c0_13 = arith.constant 0 : index
    %c0_14 = arith.constant 0 : index
    %c0_15 = arith.constant 0 : index
    %c0_16 = arith.constant 0 : index
    %13 = vector.load %arg3[%c0_13, %c0_14, %c0_15, %c0_16] : memref<8x3x16x8xf32, #tpu.memory_space<vmem>>, vector<1x1x16x8xf32>
    %14 = vector.shape_cast %13 : vector<1x1x16x8xf32> to vector<16x8xf32>
    %cst_17 = arith.constant dense<0.000000e+00> : vector<8x8xf32>
    %15 = tpu.matmul %4, %14, %cst_17 {dimension_numbers = #tpu.dot_dimension_numbers<[1], [0], [0], [1], [0, 0, 1, 1], [], []>} : vector<8x16xf32>, vector<16x8xf32>, vector<8x8xf32> -> vector<8x8xf32>
    %16 = arith.addf %12, %15 : vector<8x8xf32>
    %c0_18 = arith.constant 0 : index
    %c1_19 = arith.constant 1 : index
    %c0_20 = arith.constant 0 : index
    %c0_21 = arith.constant 0 : index
    %17 = vector.load %arg3[%c0_18, %c1_19, %c0_20, %c0_21] : memref<8x3x16x8xf32, #tpu.memory_space<vmem>>, vector<1x1x16x8xf32>
    %18 = vector.shape_cast %17 : vector<1x1x16x8xf32> to vector<16x8xf32>
    %cst_22 = arith.constant dense<0.000000e+00> : vector<8x8xf32>
    %19 = tpu.matmul %7, %18, %cst_22 {dimension_numbers = #tpu.dot_dimension_numbers<[1], [0], [0], [1], [0, 0, 1, 1], [], []>} : vector<8x16xf32>, vector<16x8xf32>, vector<8x8xf32> -> vector<8x8xf32>
    %20 = arith.addf %16, %19 : vector<8x8xf32>
    %c0_23 = arith.constant 0 : index
    %c2_24 = arith.constant 2 : index
    %c0_25 = arith.constant 0 : index
    %c0_26 = arith.constant 0 : index
    %21 = vector.load %arg3[%c0_23, %c2_24, %c0_25, %c0_26] : memref<8x3x16x8xf32, #tpu.memory_space<vmem>>, vector<1x1x16x8xf32>
    %22 = vector.shape_cast %21 : vector<1x1x16x8xf32> to vector<16x8xf32>
    %cst_27 = arith.constant dense<0.000000e+00> : vector<8x8xf32>
    %23 = tpu.matmul %10, %22, %cst_27 {dimension_numbers = #tpu.dot_dimension_numbers<[1], [0], [0], [1], [0, 0, 1, 1], [], []>} : vector<8x16xf32>, vector<16x8xf32>, vector<8x8xf32> -> vector<8x8xf32>
    %24 = arith.addf %20, %23 : vector<8x8xf32>
    %c0_28 = arith.constant 0 : index
    %c0_29 = arith.constant 0 : index
    %c0_30 = arith.constant 0 : index
    %c0_31 = arith.constant 0 : index
    %25 = vector.load %arg8[%c0_28, %c0_29, %c0_30, %c0_31] : memref<1x8x8x8xf32, #tpu.memory_space<vmem>>, vector<1x1x8x8xf32>
    %26 = vector.shape_cast %25 : vector<1x1x8x8xf32> to vector<8x8xf32>
    %27 = vector.shape_cast %24 : vector<8x8xf32> to vector<1x1x8x8xf32>
    tpu.vector_store %arg8[%c0_28, %c0_29, %c0_30, %c0_31], %27 {strides = array<i32>} : memref<1x8x8x8xf32, #tpu.memory_space<vmem>>, vector<1x1x8x8xf32>,
    %c1_32 = arith.constant 1 : index
    %28 = memref.load %arg4[%c1_32] : memref<8xf32, #tpu.memory_space<smem>>
    %29 = vector.broadcast %28 : f32 to vector<8x8xf32>
    %c1_33 = arith.constant 1 : index
    %c0_34 = arith.constant 0 : index
    %c0_35 = arith.constant 0 : index
    %c0_36 = arith.constant 0 : index
    %30 = vector.load %arg3[%c1_33, %c0_34, %c0_35, %c0_36] : memref<8x3x16x8xf32, #tpu.memory_space<vmem>>, vector<1x1x16x8xf32>
    %31 = vector.shape_cast %30 : vector<1x1x16x8xf32> to vector<16x8xf32>
    %cst_37 = arith.constant dense<0.000000e+00> : vector<8x8xf32>
    %32 = tpu.matmul %4, %31, %cst_37 {dimension_numbers = #tpu.dot_dimension_numbers<[1], [0], [0], [1], [0, 0, 1, 1], [], []>} : vector<8x16xf32>, vector<16x8xf32>, vector<8x8xf32> -> vector<8x8xf32>
    %33 = arith.addf %29, %32 : vector<8x8xf32>
    %c1_38 = arith.constant 1 : index
    %c1_39 = arith.constant 1 : index
    %c0_40 = arith.constant 0 : index
    %c0_41 = arith.constant 0 : index
    %34 = vector.load %arg3[%c1_38, %c1_39, %c0_40, %c0_41] : memref<8x3x16x8xf32, #tpu.memory_space<vmem>>, vector<1x1x16x8xf32>
    %35 = vector.shape_cast %34 : vector<1x1x16x8xf32> to vector<16x8xf32>
    %cst_42 = arith.constant dense<0.000000e+00> : vector<8x8xf32>
    %36 = tpu.matmul %7, %35, %cst_42 {dimension_numbers = #tpu.dot_dimension_numbers<[1], [0], [0], [1], [0, 0, 1, 1], [], []>} : vector<8x16xf32>, vector<16x8xf32>, vector<8x8xf32> -> vector<8x8xf32>
    %37 = arith.addf %33, %36 : vector<8x8xf32>
    %c1_43 = arith.constant 1 : index
    %c2_44 = arith.constant 2 : index
    %c0_45 = arith.constant 0 : index
    %c0_46 = arith.constant 0 : index
    %38 = vector.load %arg3[%c1_43, %c2_44, %c0_45, %c0_46] : memref<8x3x16x8xf32, #tpu.memory_space<vmem>>, vector<1x1x16x8xf32>
    %39 = vector.shape_cast %38 : vector<1x1x16x8xf32> to vector<16x8xf32>
    %cst_47 = arith.constant dense<0.000000e+00> : vector<8x8xf32>
    %40 = tpu.matmul %10, %39, %cst_47 {dimension_numbers = #tpu.dot_dimension_numbers<[1], [0], [0], [1], [0, 0, 1, 1], [], []>} : vector<8x16xf32>, vector<16x8xf32>, vector<8x8xf32> -> vector<8x8xf32>
    %41 = arith.addf %37, %40 : vector<8x8xf32>
    %c0_48 = arith.constant 0 : index
    %c1_49 = arith.constant 1 : index
    %c0_50 = arith.constant 0 : index
    %c0_51 = arith.constant 0 : index
    %42 = vector.load %arg8[%c0_48, %c1_49, %c0_50, %c0_51] : memref<1x8x8x8xf32, #tpu.memory_space<vmem>>, vector<1x1x8x8xf32>
    %43 = vector.shape_cast %42 : vector<1x1x8x8xf32> to vector<8x8xf32>
    %44 = vector.shape_cast %41 : vector<8x8xf32> to vector<1x1x8x8xf32>
    tpu.vector_store %arg8[%c0_48, %c1_49, %c0_50, %c0_51], %44 {strides = array<i32>} : memref<1x8x8x8xf32, #tpu.memory_space<vmem>>, vector<1x1x8x8xf32>,
    %c0_52 = arith.constant 0 : index
    %c1_53 = arith.constant 1 : index
    %c0_54 = arith.constant 0 : index
    %c0_55 = arith.constant 0 : index
    %45 = vector.load %arg1[%c0_52, %c1_53, %c0_54, %c0_55] : memref<1x4x16x16xf32, #tpu.memory_space<vmem>>, vector<1x1x16x16xf32>
    %46 = vector.shape_cast %45 : vector<1x1x16x16xf32> to vector<16x16xf32>
    %c0_56 = arith.constant 0 : index
    %c0_57 = arith.constant 0 : index
    %c0_58 = arith.constant 0 : index
    %47 = vector.load %arg2[%c0_56, %c0_57, %c0_58] : memref<3x8x16xf32, #tpu.memory_space<vmem>>, vector<1x8x16xf32>
    %48 = vector.shape_cast %47 : vector<1x8x16xf32> to vector<8x16xf32>
    %cst_59 = arith.constant dense<0.000000e+00> : vector<8x16xf32>
    %49 = tpu.matmul %48, %46, %cst_59 {dimension_numbers = #tpu.dot_dimension_numbers<[1], [0], [0], [1], [0, 0, 1, 1], [], []>} : vector<8x16xf32>, vector<16x16xf32>, vector<8x16xf32> -> vector<8x16xf32>
    %c1_60 = arith.constant 1 : index
    %c0_61 = arith.constant 0 : index
    %c0_62 = arith.constant 0 : index
    %50 = vector.load %arg2[%c1_60, %c0_61, %c0_62] : memref<3x8x16xf32, #tpu.memory_space<vmem>>, vector<1x8x16xf32>
    %51 = vector.shape_cast %50 : vector<1x8x16xf32> to vector<8x16xf32>
    %cst_63 = arith.constant dense<0.000000e+00> : vector<8x16xf32>
    %52 = tpu.matmul %51, %46, %cst_63 {dimension_numbers = #tpu.dot_dimension_numbers<[1], [0], [0], [1], [0, 0, 1, 1], [], []>} : vector<8x16xf32>, vector<16x16xf32>, vector<8x16xf32> -> vector<8x16xf32>
    %c2_64 = arith.constant 2 : index
    %c0_65 = arith.constant 0 : index
    %c0_66 = arith.constant 0 : index
    %53 = vector.load %arg2[%c2_64, %c0_65, %c0_66] : memref<3x8x16xf32, #tpu.memory_space<vmem>>, vector<1x8x16xf32>
    %54 = vector.shape_cast %53 : vector<1x8x16xf32> to vector<8x16xf32>
    %cst_67 = arith.constant dense<0.000000e+00> : vector<8x16xf32>
    %55 = tpu.matmul %54, %46, %cst_67 {dimension_numbers = #tpu.dot_dimension_numbers<[1], [0], [0], [1], [0, 0, 1, 1], [], []>} : vector<8x16xf32>, vector<16x16xf32>, vector<8x16xf32> -> vector<8x16xf32>
    %c2_68 = arith.constant 2 : index
    %56 = memref.load %arg4[%c2_68] : memref<8xf32, #tpu.memory_space<smem>>
    %57 = vector.broadcast %56 : f32 to vector<8x8xf32>
    %c2_69 = arith.constant 2 : index
    %c0_70 = arith.constant 0 : index
    %c0_71 = arith.constant 0 : index
    %c0_72 = arith.constant 0 : index
    %58 = vector.load %arg3[%c2_69, %c0_70, %c0_71, %c0_72] : memref<8x3x16x8xf32, #tpu.memory_space<vmem>>, vector<1x1x16x8xf32>
    %59 = vector.shape_cast %58 : vector<1x1x16x8xf32> to vector<16x8xf32>
    %cst_73 = arith.constant dense<0.000000e+00> : vector<8x8xf32>
    %60 = tpu.matmul %49, %59, %cst_73 {dimension_numbers = #tpu.dot_dimension_numbers<[1], [0], [0], [1], [0, 0, 1, 1], [], []>} : vector<8x16xf32>, vector<16x8xf32>, vector<8x8xf32> -> vector<8x8xf32>
    %61 = arith.addf %57, %60 : vector<8x8xf32>
    %c2_74 = arith.constant 2 : index
    %c1_75 = arith.constant 1 : index
    %c0_76 = arith.constant 0 : index
    %c0_77 = arith.constant 0 : index
    %62 = vector.load %arg3[%c2_74, %c1_75, %c0_76, %c0_77] : memref<8x3x16x8xf32, #tpu.memory_space<vmem>>, vector<1x1x16x8xf32>
    %63 = vector.shape_cast %62 : vector<1x1x16x8xf32> to vector<16x8xf32>
    %cst_78 = arith.constant dense<0.000000e+00> : vector<8x8xf32>
    %64 = tpu.matmul %52, %63, %cst_78 {dimension_numbers = #tpu.dot_dimension_numbers<[1], [0], [0], [1], [0, 0, 1, 1], [], []>} : vector<8x16xf32>, vector<16x8xf32>, vector<8x8xf32> -> vector<8x8xf32>
    %65 = arith.addf %61, %64 : vector<8x8xf32>
    %c2_79 = arith.constant 2 : index
    %c2_80 = arith.constant 2 : index
    %c0_81 = arith.constant 0 : index
    %c0_82 = arith.constant 0 : index
    %66 = vector.load %arg3[%c2_79, %c2_80, %c0_81, %c0_82] : memref<8x3x16x8xf32, #tpu.memory_space<vmem>>, vector<1x1x16x8xf32>
    %67 = vector.shape_cast %66 : vector<1x1x16x8xf32> to vector<16x8xf32>
    %cst_83 = arith.constant dense<0.000000e+00> : vector<8x8xf32>
    %68 = tpu.matmul %55, %67, %cst_83 {dimension_numbers = #tpu.dot_dimension_numbers<[1], [0], [0], [1], [0, 0, 1, 1], [], []>} : vector<8x16xf32>, vector<16x8xf32>, vector<8x8xf32> -> vector<8x8xf32>
    %69 = arith.addf %65, %68 : vector<8x8xf32>
    %c0_84 = arith.constant 0 : index
    %c2_85 = arith.constant 2 : index
    %c0_86 = arith.constant 0 : index
    %c0_87 = arith.constant 0 : index
    %70 = vector.load %arg8[%c0_84, %c2_85, %c0_86, %c0_87] : memref<1x8x8x8xf32, #tpu.memory_space<vmem>>, vector<1x1x8x8xf32>
    %71 = vector.shape_cast %70 : vector<1x1x8x8xf32> to vector<8x8xf32>
    %72 = vector.shape_cast %69 : vector<8x8xf32> to vector<1x1x8x8xf32>
    tpu.vector_store %arg8[%c0_84, %c2_85, %c0_86, %c0_87], %72 {strides = array<i32>} : memref<1x8x8x8xf32, #tpu.memory_space<vmem>>, vector<1x1x8x8xf32>,
    %c3 = arith.constant 3 : index
    %73 = memref.load %arg4[%c3] : memref<8xf32, #tpu.memory_space<smem>>
    %74 = vector.broadcast %73 : f32 to vector<8x8xf32>
    %c3_88 = arith.constant 3 : index
    %c0_89 = arith.constant 0 : index
    %c0_90 = arith.constant 0 : index
    %c0_91 = arith.constant 0 : index
    %75 = vector.load %arg3[%c3_88, %c0_89, %c0_90, %c0_91] : memref<8x3x16x8xf32, #tpu.memory_space<vmem>>, vector<1x1x16x8xf32>
    %76 = vector.shape_cast %75 : vector<1x1x16x8xf32> to vector<16x8xf32>
    %cst_92 = arith.constant dense<0.000000e+00> : vector<8x8xf32>
    %77 = tpu.matmul %49, %76, %cst_92 {dimension_numbers = #tpu.dot_dimension_numbers<[1], [0], [0], [1], [0, 0, 1, 1], [], []>} : vector<8x16xf32>, vector<16x8xf32>, vector<8x8xf32> -> vector<8x8xf32>
    %78 = arith.addf %74, %77 : vector<8x8xf32>
    %c3_93 = arith.constant 3 : index
    %c1_94 = arith.constant 1 : index
    %c0_95 = arith.constant 0 : index
    %c0_96 = arith.constant 0 : index
    %79 = vector.load %arg3[%c3_93, %c1_94, %c0_95, %c0_96] : memref<8x3x16x8xf32, #tpu.memory_space<vmem>>, vector<1x1x16x8xf32>
    %80 = vector.shape_cast %79 : vector<1x1x16x8xf32> to vector<16x8xf32>
    %cst_97 = arith.constant dense<0.000000e+00> : vector<8x8xf32>
    %81 = tpu.matmul %52, %80, %cst_97 {dimension_numbers = #tpu.dot_dimension_numbers<[1], [0], [0], [1], [0, 0, 1, 1], [], []>} : vector<8x16xf32>, vector<16x8xf32>, vector<8x8xf32> -> vector<8x8xf32>
    %82 = arith.addf %78, %81 : vector<8x8xf32>
    %c3_98 = arith.constant 3 : index
    %c2_99 = arith.constant 2 : index
    %c0_100 = arith.constant 0 : index
    %c0_101 = arith.constant 0 : index
    %83 = vector.load %arg3[%c3_98, %c2_99, %c0_100, %c0_101] : memref<8x3x16x8xf32, #tpu.memory_space<vmem>>, vector<1x1x16x8xf32>
    %84 = vector.shape_cast %83 : vector<1x1x16x8xf32> to vector<16x8xf32>
    %cst_102 = arith.constant dense<0.000000e+00> : vector<8x8xf32>
    %85 = tpu.matmul %55, %84, %cst_102 {dimension_numbers = #tpu.dot_dimension_numbers<[1], [0], [0], [1], [0, 0, 1, 1], [], []>} : vector<8x16xf32>, vector<16x8xf32>, vector<8x8xf32> -> vector<8x8xf32>
    %86 = arith.addf %82, %85 : vector<8x8xf32>
    %c0_103 = arith.constant 0 : index
    %c3_104 = arith.constant 3 : index
    %c0_105 = arith.constant 0 : index
    %c0_106 = arith.constant 0 : index
    %87 = vector.load %arg8[%c0_103, %c3_104, %c0_105, %c0_106] : memref<1x8x8x8xf32, #tpu.memory_space<vmem>>, vector<1x1x8x8xf32>
    %88 = vector.shape_cast %87 : vector<1x1x8x8xf32> to vector<8x8xf32>
    %89 = vector.shape_cast %86 : vector<8x8xf32> to vector<1x1x8x8xf32>
    tpu.vector_store %arg8[%c0_103, %c3_104, %c0_105, %c0_106], %89 {strides = array<i32>} : memref<1x8x8x8xf32, #tpu.memory_space<vmem>>, vector<1x1x8x8xf32>,
    %c0_107 = arith.constant 0 : index
    %c2_108 = arith.constant 2 : index
    %c0_109 = arith.constant 0 : index
    %c0_110 = arith.constant 0 : index
    %90 = vector.load %arg1[%c0_107, %c2_108, %c0_109, %c0_110] : memref<1x4x16x16xf32, #tpu.memory_space<vmem>>, vector<1x1x16x16xf32>
    %91 = vector.shape_cast %90 : vector<1x1x16x16xf32> to vector<16x16xf32>
    %c0_111 = arith.constant 0 : index
    %c0_112 = arith.constant 0 : index
    %c0_113 = arith.constant 0 : index
    %92 = vector.load %arg2[%c0_111, %c0_112, %c0_113] : memref<3x8x16xf32, #tpu.memory_space<vmem>>, vector<1x8x16xf32>
    %93 = vector.shape_cast %92 : vector<1x8x16xf32> to vector<8x16xf32>
    %cst_114 = arith.constant dense<0.000000e+00> : vector<8x16xf32>
    %94 = tpu.matmul %93, %91, %cst_114 {dimension_numbers = #tpu.dot_dimension_numbers<[1], [0], [0], [1], [0, 0, 1, 1], [], []>} : vector<8x16xf32>, vector<16x16xf32>, vector<8x16xf32> -> vector<8x16xf32>
    %c1_115 = arith.constant 1 : index
    %c0_116 = arith.constant 0 : index
    %c0_117 = arith.constant 0 : index
    %95 = vector.load %arg2[%c1_115, %c0_116, %c0_117] : memref<3x8x16xf32, #tpu.memory_space<vmem>>, vector<1x8x16xf32>
    %96 = vector.shape_cast %95 : vector<1x8x16xf32> to vector<8x16xf32>
    %cst_118 = arith.constant dense<0.000000e+00> : vector<8x16xf32>
    %97 = tpu.matmul %96, %91, %cst_118 {dimension_numbers = #tpu.dot_dimension_numbers<[1], [0], [0], [1], [0, 0, 1, 1], [], []>} : vector<8x16xf32>, vector<16x16xf32>, vector<8x16xf32> -> vector<8x16xf32>
    %c2_119 = arith.constant 2 : index
    %c0_120 = arith.constant 0 : index
    %c0_121 = arith.constant 0 : index
    %98 = vector.load %arg2[%c2_119, %c0_120, %c0_121] : memref<3x8x16xf32, #tpu.memory_space<vmem>>, vector<1x8x16xf32>
    %99 = vector.shape_cast %98 : vector<1x8x16xf32> to vector<8x16xf32>
    %cst_122 = arith.constant dense<0.000000e+00> : vector<8x16xf32>
    %100 = tpu.matmul %99, %91, %cst_122 {dimension_numbers = #tpu.dot_dimension_numbers<[1], [0], [0], [1], [0, 0, 1, 1], [], []>} : vector<8x16xf32>, vector<16x16xf32>, vector<8x16xf32> -> vector<8x16xf32>
    %c4 = arith.constant 4 : index
    %101 = memref.load %arg4[%c4] : memref<8xf32, #tpu.memory_space<smem>>
    %102 = vector.broadcast %101 : f32 to vector<8x8xf32>
    %c4_123 = arith.constant 4 : index
    %c0_124 = arith.constant 0 : index
    %c0_125 = arith.constant 0 : index
    %c0_126 = arith.constant 0 : index
    %103 = vector.load %arg3[%c4_123, %c0_124, %c0_125, %c0_126] : memref<8x3x16x8xf32, #tpu.memory_space<vmem>>, vector<1x1x16x8xf32>
    %104 = vector.shape_cast %103 : vector<1x1x16x8xf32> to vector<16x8xf32>
    %cst_127 = arith.constant dense<0.000000e+00> : vector<8x8xf32>
    %105 = tpu.matmul %94, %104, %cst_127 {dimension_numbers = #tpu.dot_dimension_numbers<[1], [0], [0], [1], [0, 0, 1, 1], [], []>} : vector<8x16xf32>, vector<16x8xf32>, vector<8x8xf32> -> vector<8x8xf32>
    %106 = arith.addf %102, %105 : vector<8x8xf32>
    %c4_128 = arith.constant 4 : index
    %c1_129 = arith.constant 1 : index
    %c0_130 = arith.constant 0 : index
    %c0_131 = arith.constant 0 : index
    %107 = vector.load %arg3[%c4_128, %c1_129, %c0_130, %c0_131] : memref<8x3x16x8xf32, #tpu.memory_space<vmem>>, vector<1x1x16x8xf32>
    %108 = vector.shape_cast %107 : vector<1x1x16x8xf32> to vector<16x8xf32>
    %cst_132 = arith.constant dense<0.000000e+00> : vector<8x8xf32>
    %109 = tpu.matmul %97, %108, %cst_132 {dimension_numbers = #tpu.dot_dimension_numbers<[1], [0], [0], [1], [0, 0, 1, 1], [], []>} : vector<8x16xf32>, vector<16x8xf32>, vector<8x8xf32> -> vector<8x8xf32>
    %110 = arith.addf %106, %109 : vector<8x8xf32>
    %c4_133 = arith.constant 4 : index
    %c2_134 = arith.constant 2 : index
    %c0_135 = arith.constant 0 : index
    %c0_136 = arith.constant 0 : index
    %111 = vector.load %arg3[%c4_133, %c2_134, %c0_135, %c0_136] : memref<8x3x16x8xf32, #tpu.memory_space<vmem>>, vector<1x1x16x8xf32>
    %112 = vector.shape_cast %111 : vector<1x1x16x8xf32> to vector<16x8xf32>
    %cst_137 = arith.constant dense<0.000000e+00> : vector<8x8xf32>
    %113 = tpu.matmul %100, %112, %cst_137 {dimension_numbers = #tpu.dot_dimension_numbers<[1], [0], [0], [1], [0, 0, 1, 1], [], []>} : vector<8x16xf32>, vector<16x8xf32>, vector<8x8xf32> -> vector<8x8xf32>
    %114 = arith.addf %110, %113 : vector<8x8xf32>
    %c0_138 = arith.constant 0 : index
    %c4_139 = arith.constant 4 : index
    %c0_140 = arith.constant 0 : index
    %c0_141 = arith.constant 0 : index
    %115 = vector.load %arg8[%c0_138, %c4_139, %c0_140, %c0_141] : memref<1x8x8x8xf32, #tpu.memory_space<vmem>>, vector<1x1x8x8xf32>
    %116 = vector.shape_cast %115 : vector<1x1x8x8xf32> to vector<8x8xf32>
    %117 = vector.shape_cast %114 : vector<8x8xf32> to vector<1x1x8x8xf32>
    tpu.vector_store %arg8[%c0_138, %c4_139, %c0_140, %c0_141], %117 {strides = array<i32>} : memref<1x8x8x8xf32, #tpu.memory_space<vmem>>, vector<1x1x8x8xf32>,
    %c5 = arith.constant 5 : index
    %118 = memref.load %arg4[%c5] : memref<8xf32, #tpu.memory_space<smem>>
    %119 = vector.broadcast %118 : f32 to vector<8x8xf32>
    %c5_142 = arith.constant 5 : index
    %c0_143 = arith.constant 0 : index
    %c0_144 = arith.constant 0 : index
    %c0_145 = arith.constant 0 : index
    %120 = vector.load %arg3[%c5_142, %c0_143, %c0_144, %c0_145] : memref<8x3x16x8xf32, #tpu.memory_space<vmem>>, vector<1x1x16x8xf32>
    %121 = vector.shape_cast %120 : vector<1x1x16x8xf32> to vector<16x8xf32>
    %cst_146 = arith.constant dense<0.000000e+00> : vector<8x8xf32>
    %122 = tpu.matmul %94, %121, %cst_146 {dimension_numbers = #tpu.dot_dimension_numbers<[1], [0], [0], [1], [0, 0, 1, 1], [], []>} : vector<8x16xf32>, vector<16x8xf32>, vector<8x8xf32> -> vector<8x8xf32>
    %123 = arith.addf %119, %122 : vector<8x8xf32>
    %c5_147 = arith.constant 5 : index
    %c1_148 = arith.constant 1 : index
    %c0_149 = arith.constant 0 : index
    %c0_150 = arith.constant 0 : index
    %124 = vector.load %arg3[%c5_147, %c1_148, %c0_149, %c0_150] : memref<8x3x16x8xf32, #tpu.memory_space<vmem>>, vector<1x1x16x8xf32>
    %125 = vector.shape_cast %124 : vector<1x1x16x8xf32> to vector<16x8xf32>
    %cst_151 = arith.constant dense<0.000000e+00> : vector<8x8xf32>
    %126 = tpu.matmul %97, %125, %cst_151 {dimension_numbers = #tpu.dot_dimension_numbers<[1], [0], [0], [1], [0, 0, 1, 1], [], []>} : vector<8x16xf32>, vector<16x8xf32>, vector<8x8xf32> -> vector<8x8xf32>
    %127 = arith.addf %123, %126 : vector<8x8xf32>
    %c5_152 = arith.constant 5 : index
    %c2_153 = arith.constant 2 : index
    %c0_154 = arith.constant 0 : index
    %c0_155 = arith.constant 0 : index
    %128 = vector.load %arg3[%c5_152, %c2_153, %c0_154, %c0_155] : memref<8x3x16x8xf32, #tpu.memory_space<vmem>>, vector<1x1x16x8xf32>
    %129 = vector.shape_cast %128 : vector<1x1x16x8xf32> to vector<16x8xf32>
    %cst_156 = arith.constant dense<0.000000e+00> : vector<8x8xf32>
    %130 = tpu.matmul %100, %129, %cst_156 {dimension_numbers = #tpu.dot_dimension_numbers<[1], [0], [0], [1], [0, 0, 1, 1], [], []>} : vector<8x16xf32>, vector<16x8xf32>, vector<8x8xf32> -> vector<8x8xf32>
    %131 = arith.addf %127, %130 : vector<8x8xf32>
    %c0_157 = arith.constant 0 : index
    %c5_158 = arith.constant 5 : index
    %c0_159 = arith.constant 0 : index
    %c0_160 = arith.constant 0 : index
    %132 = vector.load %arg8[%c0_157, %c5_158, %c0_159, %c0_160] : memref<1x8x8x8xf32, #tpu.memory_space<vmem>>, vector<1x1x8x8xf32>
    %133 = vector.shape_cast %132 : vector<1x1x8x8xf32> to vector<8x8xf32>
    %134 = vector.shape_cast %131 : vector<8x8xf32> to vector<1x1x8x8xf32>
    tpu.vector_store %arg8[%c0_157, %c5_158, %c0_159, %c0_160], %134 {strides = array<i32>} : memref<1x8x8x8xf32, #tpu.memory_space<vmem>>, vector<1x1x8x8xf32>,
    %c0_161 = arith.constant 0 : index
    %c3_162 = arith.constant 3 : index
    %c0_163 = arith.constant 0 : index
    %c0_164 = arith.constant 0 : index
    %135 = vector.load %arg1[%c0_161, %c3_162, %c0_163, %c0_164] : memref<1x4x16x16xf32, #tpu.memory_space<vmem>>, vector<1x1x16x16xf32>
    %136 = vector.shape_cast %135 : vector<1x1x16x16xf32> to vector<16x16xf32>
    %c0_165 = arith.constant 0 : index
    %c0_166 = arith.constant 0 : index
    %c0_167 = arith.constant 0 : index
    %137 = vector.load %arg2[%c0_165, %c0_166, %c0_167] : memref<3x8x16xf32, #tpu.memory_space<vmem>>, vector<1x8x16xf32>
    %138 = vector.shape_cast %137 : vector<1x8x16xf32> to vector<8x16xf32>
    %cst_168 = arith.constant dense<0.000000e+00> : vector<8x16xf32>
    %139 = tpu.matmul %138, %136, %cst_168 {dimension_numbers = #tpu.dot_dimension_numbers<[1], [0], [0], [1], [0, 0, 1, 1], [], []>} : vector<8x16xf32>, vector<16x16xf32>, vector<8x16xf32> -> vector<8x16xf32>
    %c1_169 = arith.constant 1 : index
    %c0_170 = arith.constant 0 : index
    %c0_171 = arith.constant 0 : index
    %140 = vector.load %arg2[%c1_169, %c0_170, %c0_171] : memref<3x8x16xf32, #tpu.memory_space<vmem>>, vector<1x8x16xf32>
    %141 = vector.shape_cast %140 : vector<1x8x16xf32> to vector<8x16xf32>
    %cst_172 = arith.constant dense<0.000000e+00> : vector<8x16xf32>
    %142 = tpu.matmul %141, %136, %cst_172 {dimension_numbers = #tpu.dot_dimension_numbers<[1], [0], [0], [1], [0, 0, 1, 1], [], []>} : vector<8x16xf32>, vector<16x16xf32>, vector<8x16xf32> -> vector<8x16xf32>
    %c2_173 = arith.constant 2 : index
    %c0_174 = arith.constant 0 : index
    %c0_175 = arith.constant 0 : index
    %143 = vector.load %arg2[%c2_173, %c0_174, %c0_175] : memref<3x8x16xf32, #tpu.memory_space<vmem>>, vector<1x8x16xf32>
    %144 = vector.shape_cast %143 : vector<1x8x16xf32> to vector<8x16xf32>
    %cst_176 = arith.constant dense<0.000000e+00> : vector<8x16xf32>
    %145 = tpu.matmul %144, %136, %cst_176 {dimension_numbers = #tpu.dot_dimension_numbers<[1], [0], [0], [1], [0, 0, 1, 1], [], []>} : vector<8x16xf32>, vector<16x16xf32>, vector<8x16xf32> -> vector<8x16xf32>
    %c6 = arith.constant 6 : index
    %146 = memref.load %arg4[%c6] : memref<8xf32, #tpu.memory_space<smem>>
    %147 = vector.broadcast %146 : f32 to vector<8x8xf32>
    %c6_177 = arith.constant 6 : index
    %c0_178 = arith.constant 0 : index
    %c0_179 = arith.constant 0 : index
    %c0_180 = arith.constant 0 : index
    %148 = vector.load %arg3[%c6_177, %c0_178, %c0_179, %c0_180] : memref<8x3x16x8xf32, #tpu.memory_space<vmem>>, vector<1x1x16x8xf32>
    %149 = vector.shape_cast %148 : vector<1x1x16x8xf32> to vector<16x8xf32>
    %cst_181 = arith.constant dense<0.000000e+00> : vector<8x8xf32>
    %150 = tpu.matmul %139, %149, %cst_181 {dimension_numbers = #tpu.dot_dimension_numbers<[1], [0], [0], [1], [0, 0, 1, 1], [], []>} : vector<8x16xf32>, vector<16x8xf32>, vector<8x8xf32> -> vector<8x8xf32>
    %151 = arith.addf %147, %150 : vector<8x8xf32>
    %c6_182 = arith.constant 6 : index
    %c1_183 = arith.constant 1 : index
    %c0_184 = arith.constant 0 : index
    %c0_185 = arith.constant 0 : index
    %152 = vector.load %arg3[%c6_182, %c1_183, %c0_184, %c0_185] : memref<8x3x16x8xf32, #tpu.memory_space<vmem>>, vector<1x1x16x8xf32>
    %153 = vector.shape_cast %152 : vector<1x1x16x8xf32> to vector<16x8xf32>
    %cst_186 = arith.constant dense<0.000000e+00> : vector<8x8xf32>
    %154 = tpu.matmul %142, %153, %cst_186 {dimension_numbers = #tpu.dot_dimension_numbers<[1], [0], [0], [1], [0, 0, 1, 1], [], []>} : vector<8x16xf32>, vector<16x8xf32>, vector<8x8xf32> -> vector<8x8xf32>
    %155 = arith.addf %151, %154 : vector<8x8xf32>
    %c6_187 = arith.constant 6 : index
    %c2_188 = arith.constant 2 : index
    %c0_189 = arith.constant 0 : index
    %c0_190 = arith.constant 0 : index
    %156 = vector.load %arg3[%c6_187, %c2_188, %c0_189, %c0_190] : memref<8x3x16x8xf32, #tpu.memory_space<vmem>>, vector<1x1x16x8xf32>
    %157 = vector.shape_cast %156 : vector<1x1x16x8xf32> to vector<16x8xf32>
    %cst_191 = arith.constant dense<0.000000e+00> : vector<8x8xf32>
    %158 = tpu.matmul %145, %157, %cst_191 {dimension_numbers = #tpu.dot_dimension_numbers<[1], [0], [0], [1], [0, 0, 1, 1], [], []>} : vector<8x16xf32>, vector<16x8xf32>, vector<8x8xf32> -> vector<8x8xf32>
    %159 = arith.addf %155, %158 : vector<8x8xf32>
    %c0_192 = arith.constant 0 : index
    %c6_193 = arith.constant 6 : index
    %c0_194 = arith.constant 0 : index
    %c0_195 = arith.constant 0 : index
    %160 = vector.load %arg8[%c0_192, %c6_193, %c0_194, %c0_195] : memref<1x8x8x8xf32, #tpu.memory_space<vmem>>, vector<1x1x8x8xf32>
    %161 = vector.shape_cast %160 : vector<1x1x8x8xf32> to vector<8x8xf32>
    %162 = vector.shape_cast %159 : vector<8x8xf32> to vector<1x1x8x8xf32>
    tpu.vector_store %arg8[%c0_192, %c6_193, %c0_194, %c0_195], %162 {strides = array<i32>} : memref<1x8x8x8xf32, #tpu.memory_space<vmem>>, vector<1x1x8x8xf32>,
    %c7 = arith.constant 7 : index
    %163 = memref.load %arg4[%c7] : memref<8xf32, #tpu.memory_space<smem>>
    %164 = vector.broadcast %163 : f32 to vector<8x8xf32>
    %c7_196 = arith.constant 7 : index
    %c0_197 = arith.constant 0 : index
    %c0_198 = arith.constant 0 : index
    %c0_199 = arith.constant 0 : index
    %165 = vector.load %arg3[%c7_196, %c0_197, %c0_198, %c0_199] : memref<8x3x16x8xf32, #tpu.memory_space<vmem>>, vector<1x1x16x8xf32>
    %166 = vector.shape_cast %165 : vector<1x1x16x8xf32> to vector<16x8xf32>
    %cst_200 = arith.constant dense<0.000000e+00> : vector<8x8xf32>
    %167 = tpu.matmul %139, %166, %cst_200 {dimension_numbers = #tpu.dot_dimension_numbers<[1], [0], [0], [1], [0, 0, 1, 1], [], []>} : vector<8x16xf32>, vector<16x8xf32>, vector<8x8xf32> -> vector<8x8xf32>
    %168 = arith.addf %164, %167 : vector<8x8xf32>
    %c7_201 = arith.constant 7 : index
    %c1_202 = arith.constant 1 : index
    %c0_203 = arith.constant 0 : index
    %c0_204 = arith.constant 0 : index
    %169 = vector.load %arg3[%c7_201, %c1_202, %c0_203, %c0_204] : memref<8x3x16x8xf32, #tpu.memory_space<vmem>>, vector<1x1x16x8xf32>
    %170 = vector.shape_cast %169 : vector<1x1x16x8xf32> to vector<16x8xf32>
    %cst_205 = arith.constant dense<0.000000e+00> : vector<8x8xf32>
    %171 = tpu.matmul %142, %170, %cst_205 {dimension_numbers = #tpu.dot_dimension_numbers<[1], [0], [0], [1], [0, 0, 1, 1], [], []>} : vector<8x16xf32>, vector<16x8xf32>, vector<8x8xf32> -> vector<8x8xf32>
    %172 = arith.addf %168, %171 : vector<8x8xf32>
    %c7_206 = arith.constant 7 : index
    %c2_207 = arith.constant 2 : index
    %c0_208 = arith.constant 0 : index
    %c0_209 = arith.constant 0 : index
    %173 = vector.load %arg3[%c7_206, %c2_207, %c0_208, %c0_209] : memref<8x3x16x8xf32, #tpu.memory_space<vmem>>, vector<1x1x16x8xf32>
    %174 = vector.shape_cast %173 : vector<1x1x16x8xf32> to vector<16x8xf32>
    %cst_210 = arith.constant dense<0.000000e+00> : vector<8x8xf32>
    %175 = tpu.matmul %145, %174, %cst_210 {dimension_numbers = #tpu.dot_dimension_numbers<[1], [0], [0], [1], [0, 0, 1, 1], [], []>} : vector<8x16xf32>, vector<16x8xf32>, vector<8x8xf32> -> vector<8x8xf32>
    %176 = arith.addf %172, %175 : vector<8x8xf32>
    %c0_211 = arith.constant 0 : index
    %c7_212 = arith.constant 7 : index
    %c0_213 = arith.constant 0 : index
    %c0_214 = arith.constant 0 : index
    %177 = vector.load %arg8[%c0_211, %c7_212, %c0_213, %c0_214] : memref<1x8x8x8xf32, #tpu.memory_space<vmem>>, vector<1x1x8x8xf32>
    %178 = vector.shape_cast %177 : vector<1x1x8x8xf32> to vector<8x8xf32>
    %179 = vector.shape_cast %176 : vector<8x8xf32> to vector<1x1x8x8xf32>
    tpu.vector_store %arg8[%c0_211, %c7_212, %c0_213, %c0_214], %179 {strides = array<i32>} : memref<1x8x8x8xf32, #tpu.memory_space<vmem>>, vector<1x1x8x8xf32>,
    %c0_215 = arith.constant 0 : index
    %c0_216 = arith.constant 0 : index
    %c0_217 = arith.constant 0 : index
    %180 = vector.load %arg5[%c0_215, %c0_216, %c0_217] : memref<1x1x4xf32, #tpu.memory_space<vmem>>, vector<1x1x4xf32>
    %181 = vector.shape_cast %180 : vector<1x1x4xf32> to vector<1x4xf32>
    %c0_218 = arith.constant 0 : index
    %c0_219 = arith.constant 0 : index
    %182 = vector.load %arg6[%c0_218, %c0_219] : memref<4x8xf32, #tpu.memory_space<vmem>>, vector<4x8xf32>
    %cst_220 = arith.constant dense<0.000000e+00> : vector<1x8xf32>
    %183 = tpu.matmul %181, %182, %cst_220 {dimension_numbers = #tpu.dot_dimension_numbers<[1], [0], [0], [1], [0, 0, 1, 1], [], []>} : vector<1x4xf32>, vector<4x8xf32>, vector<1x8xf32> -> vector<1x8xf32>
    %c0_221 = arith.constant 0 : index
    %c0_222 = arith.constant 0 : index
    %184 = vector.load %arg7[%c0_221, %c0_222] : memref<1x8xf32, #tpu.memory_space<vmem>>, vector<1x8xf32>
    %185 = arith.addf %183, %184 : vector<1x8xf32>
    %c0_223 = arith.constant 0 : index
    %c0_224 = arith.constant 0 : index
    %c0_225 = arith.constant 0 : index
    %186 = vector.load %arg9[%c0_223, %c0_224, %c0_225] : memref<1x1x8xf32, #tpu.memory_space<vmem>>, vector<1x1x8xf32>
    %187 = vector.shape_cast %186 : vector<1x1x8xf32> to vector<1x8xf32>
    %188 = vector.shape_cast %185 : vector<1x8xf32> to vector<1x1x8xf32>
    tpu.vector_store %arg9[%c0_223, %c0_224, %c0_225], %188 {strides = array<i32>} : memref<1x1x8xf32, #tpu.memory_space<vmem>>, vector<1x1x8xf32>,
    return
  }
  func.func @transform_0(%arg0: i32) -> (i32, i32, i32, i32) {
    %c0_i32 = arith.constant 0 : i32
    %c0_i32_0 = arith.constant 0 : i32
    %c0_i32_1 = arith.constant 0 : i32
    %c0_i32_2 = arith.constant 0 : i32
    return %arg0, %c0_i32, %c0_i32_0, %c0_i32_1 : i32, i32, i32, i32
  }
  func.func @transform_1(%arg0: i32) -> (i32, i32, i32) {
    %c0_i32 = arith.constant 0 : i32
    %c0_i32_0 = arith.constant 0 : i32
    %c0_i32_1 = arith.constant 0 : i32
    %c0_i32_2 = arith.constant 0 : i32
    return %c0_i32, %c0_i32_0, %c0_i32_1 : i32, i32, i32
  }
  func.func @transform_2(%arg0: i32) -> (i32, i32, i32, i32) {
    %c0_i32 = arith.constant 0 : i32
    %c0_i32_0 = arith.constant 0 : i32
    %c0_i32_1 = arith.constant 0 : i32
    %c0_i32_2 = arith.constant 0 : i32
    %c0_i32_3 = arith.constant 0 : i32
    return %c0_i32, %c0_i32_0, %c0_i32_1, %c0_i32_2 : i32, i32, i32, i32
  }
  func.func @transform_3(%arg0: i32) -> i32 {
    %c0_i32 = arith.constant 0 : i32
    %c0_i32_0 = arith.constant 0 : i32
    return %c0_i32 : i32
  }
  func.func @transform_4(%arg0: i32) -> (i32, i32, i32) {
    %c0_i32 = arith.constant 0 : i32
    %c0_i32_0 = arith.constant 0 : i32
    %c0_i32_1 = arith.constant 0 : i32
    return %arg0, %c0_i32, %c0_i32_0 : i32, i32, i32
  }
  func.func @transform_5(%arg0: i32) -> (i32, i32) {
    %c0_i32 = arith.constant 0 : i32
    %c0_i32_0 = arith.constant 0 : i32
    %c0_i32_1 = arith.constant 0 : i32
    return %c0_i32, %c0_i32_0 : i32, i32
  }
  func.func @transform_6(%arg0: i32) -> (i32, i32) {
    %c0_i32 = arith.constant 0 : i32
    %c0_i32_0 = arith.constant 0 : i32
    %c0_i32_1 = arith.constant 0 : i32
    return %c0_i32, %c0_i32_0 : i32, i32
  }
  func.func @transform_7(%arg0: i32) -> (i32, i32, i32, i32) {
    %c0_i32 = arith.constant 0 : i32
    %c0_i32_0 = arith.constant 0 : i32
    %c0_i32_1 = arith.constant 0 : i32
    %c0_i32_2 = arith.constant 0 : i32
    return %arg0, %c0_i32, %c0_i32_0, %c0_i32_1 : i32, i32, i32, i32
  }
  func.func @transform_8(%arg0: i32) -> (i32, i32, i32) {
    %c0_i32 = arith.constant 0 : i32
    %c0_i32_0 = arith.constant 0 : i32
    %c0_i32_1 = arith.constant 0 : i32
    return %arg0, %c0_i32, %c0_i32_0 : i32, i32, i32
  }
}

</mosaic_0001>

<bundles_post_ra>
// kernel: tpu_custom_call.1
= control target key start
LH: loop header
LB: loop body
LE: loop exit
PB: predicated region body
PF: predicated region fallthrough
CT: control target
= control target key end

     0   :  { %14 = vsyncpa [#allocation4], 0  ;;  %s4584_s0 = inlined_call_operand.vmem [shape: f32[2,4,16,16], index: 0, kind: input, shape index: {}]   ;;  %s4585_s1 = inlined_call_operand.vmem [shape: f32[3,8,16], index: 1, kind: input, shape index: {}]   ;;  %s4586_s2 = inlined_call_operand.vmem [shape: f32[8,3,16,8], index: 2, kind: input, shape index: {}]   ;;  %s4587_s3 = inlined_call_operand.vmem [shape: f32[8], index: 3, kind: input, shape index: {}]   ;;  %s4588_s4 = inlined_call_operand.vmem [shape: f32[2,1,4], index: 4, kind: input, shape index: {}]   ;;  %s4589_s5 = inlined_call_operand.vmem [shape: f32[4,8], index: 5, kind: input, shape index: {}]   ;;  %s4590_s6 = inlined_call_operand.vmem [shape: f32[1,8], index: 6, kind: input, shape index: {}]   ;;  %s4591_s7 = inlined_call_operand.hbm [shape: f32[2,8,8,8], index: 7, kind: output, shape index: {0}]   ;;  %s4592_s8 = inlined_call_operand.hbm [shape: f32[2,1,8], index: 8, kind: output, shape index: {1}]  }
   0x1   :  { %15 = vsyncpa [#allocation3], 0 }
   0x2   :  { %17 = vsyncpa [#allocation3 + $0x1], 0 }
   0x3   :  { %18 = vsyncpa [#allocation7], 0 }
   0x4   :  { %20 = vsyncpa [#allocation7 + $0x1], 0  ;;  %s4030_s27 = smov 0   ;;  %s4032_s28 = smov 0  }
   0x5   :  { %s4034_s29 = smov 0   ;;  %s4036_s30 = smov 0  }
   0x6 LB: > { %s4051_s9 = sadd.s32 4294967295, %s3976_s30   ;;  %s3312_s10 = sadd.s32 4294967294, %s3976_s30   ;;  %s3976_s30 = sphi %s4036_s30, %s4602_s30   ;;  %s3972_s29 = sphi %s4034_s29, %s4601_s29   ;;  %s3968_s28 = sphi %s4032_s28, %s4600_s28   ;;  %s3964_s27 = sphi %s4030_s27, %s4599_s27  }
   0x7   : > { %s4055_s11 = sadd.s32 1, %s3976_s30   ;;  %s190_s12 = sadd.s32 1, %s3972_s29 }
   0x8   : > { %s187_s13 = ssub.s32 %s3976_s30, %s4055_s11  ;;  %p200_p0 = scmp.ne.s32.totalorder %s3972_s29, %s3968_s28 }
   0x9   : > { %p188_p1 = scmp.eq.s32.totalorder %s187_s13, 0  ;;  %p201_p2 = scmp.eq.s32.totalorder %s4051_s9, 1 }
   0xa   : > { %p206_p3 = scmp.ne.s32.totalorder %s3968_s28, %s3964_s27  ;;  %p207_p4 = scmp.eq.s32.totalorder %s3312_s10, 1 }
   0xb   : > { %s4066_s14 = scalar_select %p188_p1, %s3972_s29, %s190_s12  }
   0xc   : > { %p4068_p5 = por %p201_p2, %p200_p0  ;;  %p4072_p6 = por %p207_p4, %p206_p3 }
   0xd   : > { %p3313_p7 = scmp.ge.s32.totalorder %s3976_s30, 1  ;;  %p240_p8 = scmp.lt.s32.totalorder %s3976_s30, 3 }
   0xe   : > { %p3827_p9 = scmp.eq.s32.totalorder %s4051_s9, 0  ;;  %s259_s20 = sshll.u32 %s4587_s3, 4  ;;  %s260_s20 = int_to_ptr.vmem [resolvable:$true] %s259_s20 }
   0xf   : > { %p4079_p10 = pnand %p3313_p7, %p240_p8  ;;  %s3867_s21 = scalar_lea.vmem %s260_s20, 16 }
  0x10   : > { %p3868_p13 = scmp.ne.s32.totalorder %s260_s20, %s3867_s21  ;;  %p3875_p3 = scmp.lt.s32.totalorder %s260_s20, %s260_s20 }
  0x11   : > { %p3816_p11 = pneg %p4079_p10  ;;  %p3876_p4 = scmp.lt.s32.totalorder %s3867_s21, %s3867_s21 }
  0x13   : > { %p3817_p12 = pnand %p3827_p9, %p3816_p11  ;;  %p3877_p7 = por %p3876_p4, %p3875_p3 }
  0x15   : > { %p3869_p0 = pneg %p3817_p12 }
  0x17   : > { %p3870_p1 = pnand %p3869_p0, %p3868_p13 }
  0x19   : > { %p3871_p2 = pneg %p3870_p1 }
  0x1b   : > { %p3878_p8 = pnand %p3877_p7, %p3871_p2 }
  0x1d   : > { %3881 = shalt.err (!%p3878_p8)
}
  0x1e   : > { %s3978_s22 = smov [#allocation2]   ;;  %292 = sbr.rel (%p4079_p10) target bundleno = 1117 (0x45d), region = 48 }
  0x1f   : > { %3819 = dma.vmem_to_smem (!%p3817_p12), %s260_s20, 16, %s3978_s22, [#allocation4]  }
  0x23   : > { %3951 = dma.done.wait (%p3827_p9), [#allocation4], 16  }
  0x24   : > { %3953 = vsyncadd (%p3827_p9), [#allocation4], 4294967280 }
  0x25   : > { %298 = sfence }
  0x26   : > { %p334_p11 = scmp.lt.s32.totalorder %s4051_s9, 1  ;;  %v3979_v0 = vmov 0.0   ;;  %vm3980_vm0 = vmmov 0   ;;  %v4117_v3 = vld [vmem:[%s4585_s1] sm:$0xff]  ;;  %vm345_vm1 = vcmask 130048   ;;  %v4122_v4 = vld [vmem:[%s4585_s1 + $0x8] sm:$0xff] }
  0x27   : > { %3551 = vmatprep.subr.mxu0 %v3979_v0  ;;  %3558 = vmatprep.subr.mxu1 %v3979_v0  ;;  %v572_v5 = vld [vmem:[%s4586_s2 + $0x8] sm:$0xff]  ;;  %v4139_v6 = vld [vmem:[%s4585_s1 + $0x10] sm:$0xff]  ;;  %v3328_v7 = vld [vmem:[%s4586_s2 + $0x18] sm:$0xff]  ;;  %s569_s20 = sld [smem:[#allocation2]]  ;;  %s4250_s21 = sand.u32 1, %s3968_s28   ;;  %vm801_vm2 = vcmask 64512  }
  0x28   : > { %s4100_s23 = scalar_select %p334_p11, %s4051_s9, 1  ;;  %3555 = vmatprep.mubr.msk.f32.mxu0 %vm3980_vm0, %v3979_v0  ;;  %3562 = vmatprep.mubr.msk.f32.mxu1 %vm3980_vm0, %v3979_v0  ;;  %v571_v8 = vld [vmem:[%s4586_s2] sm:$0xff]  ;;  %v3327_v9 = vld [vmem:[%s4586_s2 + $0x10] sm:$0xff]  ;;  %v3331_v10 = vld [vmem:[%s4586_s2 + $0x28] sm:$0xff]  ;;  %vm3094_vm3 = vcmask 1043456   ;;  %vm3090_vm4 = vcmask 31744  }
  0x29   : > { %v3335_v11 = vld [vmem:[%s4586_s2 + $0x38] sm:$0xff]  ;;  %v3330_v14 = vld [vmem:[%s4586_s2 + $0x20] sm:$0xff]  ;;  %v3334_v16 = vld [vmem:[%s4586_s2 + $0x30] sm:$0xff]  ;;  %s3333_s22 = sld [smem:[#allocation2 + $0x1]]  ;;  %vm3168_vm5 = vcmask 57344   ;;  %s3981_s17 = smov [#allocation5]  }
  0x2a   : > { %s3439_s24 = sshll.u32 %s4100_s23, 6  ;;  %v3338_v19 = vld [vmem:[%s4586_s2 + $0x48] sm:$0xff]  ;;  %v3341_v20 = vld [vmem:[%s4586_s2 + $0x58] sm:$0xff]  ;;  %v3337_v22 = vld [vmem:[%s4586_s2 + $0x40] sm:$0xff]  ;;  %s3380_s18 = sld [smem:[#allocation2 + $0x4]] }
  0x2b   : > { %s4110_s10 = scalar_lea.vmem %s4584_s0, %s3439_s24  ;;  %v3340_v23 = vld [vmem:[%s4586_s2 + $0x50] sm:$0xff]  ;;  %v3353_v26 = vld [vmem:[%s4586_s2 + $0x68] sm:$0xff]  ;;  %v3356_v27 = vld [vmem:[%s4586_s2 + $0x78] sm:$0xff]  ;;  %s3318_s24 = sshll.u32 %s4250_s21, 6 }
  0x2c   : > { %v343_v1 = vld [vmem:[%s4110_s10 + $0x8] sm:$0xff]  ;;  %v342_v2 = vld [vmem:[%s4110_s10] sm:$0xff]  ;;  %v3345_v24 = vld [vmem:[%s4110_s10 + $0x18] sm:$0xff]  ;;  %s4253_s25 = scalar_lea.vmem [#allocation5], %s3318_s24  ;;  %s3391_s19 = sld [smem:[#allocation2 + $0x5]] }
  0x2d   : > { %3552 = vmatpush3.msra.mxu0 %v343_v1  ;;  %3559 = vmatpush3.msra.mxu1 %v343_v1  ;;  %v3344_v25 = vld [vmem:[%s4110_s10 + $0x10] sm:$0xff]  ;;  %v3352_v28 = vld [vmem:[%s4586_s2 + $0x60] sm:$0xff]  ;;  %v570_v30 = vstv %s569_s20  ;;  %v3359_v50 = vld [vmem:[%s4586_s2 + $0x88] sm:$0xff]  ;;  %s3351_s20 = sld [smem:[#allocation2 + $0x2]]  ;;  %s3188_s24 = sshll.u32 %s4253_s25, 4  ;;  %s4502_s24 = int_to_ptr.vmem [resolvable:$true] %s3188_s24 }
  0x2e   : > { %3553 = vmatprep.subr.mxu0 %v3979_v0  ;;  %3560 = vmatprep.subr.mxu1 %v3979_v0  ;;  %v3355_v29 = vld [vmem:[%s4586_s2 + $0x70] sm:$0xff]  ;;  %v3364_v51 = vld [vmem:[%s4586_s2 + $0x98] sm:$0xff]  ;;  %v3358_v54 = vld [vmem:[%s4586_s2 + $0x80] sm:$0xff] }
  0x2f   : > { %3554 = vmatpush3.msra.mxu0 %v342_v2  ;;  %3561 = vmatpush3.msra.mxu1 %v342_v2  ;;  %v804_v40 = vstv %s3333_s22  ;;  %v3363_v56 = vld [vmem:[%s4586_s2 + $0x90] sm:$0xff]  ;;  %v3367_v59 = vld [vmem:[%s4586_s2 + $0xa8] sm:$0xff]  ;;  %v3370_v60 = vld [vmem:[%s4586_s2 + $0xb8] sm:$0xff]  ;;  %s3362_s22 = sld [smem:[#allocation2 + $0x3]] }
  0x30   : > { %3556 = vmatmul.mubr.msk.f32.vlgmr.msra.gmra.mxu0 %vm345_vm1, %v4117_v3  ;;  %3563 = vmatmul.mubr.msk.f32.vlgmr.msra.gmra.mxu1 %vm345_vm1, %v4122_v4  ;;  %v3366_v62 = vld [vmem:[%s4586_s2 + $0xa0] sm:$0xff]  ;;  %v3369_v63 = vld [vmem:[%s4586_s2 + $0xb0] sm:$0xff] }
  0x31   : > { %3565 = vmatprep.subr.mxu0 %v3979_v0  ;;  %3569 = vmatprep.mubr.msk.f32.mxu0 %vm3980_vm0, %v3979_v0 }
  0x32   : > { %3566 = vmatpush3.msra.mxu0 %v343_v1  ;;  %3572 = vmatprep.subr.mxu1 %v3979_v0  ;;  %v3374_v1 = vld [vmem:[%s4110_s10 + $0x28] sm:$0xff] }
  0x33   : > { %3567 = vmatprep.subr.mxu0 %v3979_v0  ;;  %3573 = vmatpush3.msra.mxu1 %v572_v5  ;;  %v3382_v5 = vld [vmem:[%s4586_s2 + $0xc8] sm:$0xff] }
  0x34   : > { %3568 = vmatpush3.msra.mxu0 %v342_v2  ;;  %3574 = vmatprep.subr.mxu1 %v3979_v0  ;;  %v3373_v2 = vld [vmem:[%s4110_s10 + $0x20] sm:$0xff] }
  0x35   : > { %3570 = vmatmul.mubr.msk.f32.vlgmr.msra.gmra.mxu0 %vm345_vm1, %v4139_v6  ;;  %3579 = vmatprep.subr.mxu0 %v3979_v0 }
  0x36   : > { %3580 = vmatpush3.msra.mxu0 %v3328_v7  ;;  %3576 = vmatprep.mubr.msk.f32.mxu1 %vm3980_vm0, %v3979_v0  ;;  %v3385_v7 = vld [vmem:[%s4586_s2 + $0xd8] sm:$0xff] }
  0x37   : > { %3581 = vmatprep.subr.mxu0 %v3979_v0  ;;  %3583 = vmatprep.mubr.msk.f32.mxu0 %vm3980_vm0, %v3979_v0 }
  0x38   : > { %3575 = vmatpush3.msra.mxu1 %v571_v8  ;;  %3582 = vmatpush3.msra.mxu0 %v3327_v9  ;;  %v3381_v8 = vld [vmem:[%s4586_s2 + $0xc0] sm:$0xff]  ;;  %v3384_v9 = vld [vmem:[%s4586_s2 + $0xd0] sm:$0xff] }
  0x39   : > { %3586 = vmatprep.subr.mxu1 %v3979_v0  ;;  %3593 = vmatprep.subr.mxu0 %v3979_v0 }
  0xf0   : > { %v415_v12 = vpop.f32.mrf.mxu0  ;;  %v490_v13 = vpop.f32.mrf.mxu1 }
  0xf1   : > { %3577 = vmatmul.mubr.msk.f32.vlgmr.msra.gmra.mxu1 %vm345_vm1, %v415_v12  ;;  %3584 = vmatmul.mubr.msk.f32.vlgmr.msra.gmra.mxu0 %vm345_vm1, %v490_v13 }
  0xf2   : > { %v3557_v15 = vpop.f32.mrf.mxu0  ;;  %3587 = vmatpush3.msra.mxu1 %v3331_v10  ;;  %3594 = vmatpush3.msra.mxu0 %v3335_v11  ;;  %v3564_v17 = vpop.f32.mrf.mxu1  ;;  %v1255_v10 = vstv %s3351_s20  ;;  %s3420_s20 = sld [smem:[#allocation2 + $0x7]] }
  0xf3   : > { %3588 = vmatprep.subr.mxu1 %v3979_v0  ;;  %3595 = vmatprep.subr.mxu0 %v3979_v0 }
  0xf4   : > { %3589 = vmatpush3.msra.mxu1 %v3330_v14  ;;  %3590 = vmatprep.mubr.msk.f32.mxu1 %vm3980_vm0, %v3979_v0 }
  0xf5   : > { %v565_v18 = vpop.f32.mrf.mxu0  ;;  %3596 = vmatpush3.msra.mxu0 %v3334_v16  ;;  %3597 = vmatprep.mubr.msk.f32.mxu0 %vm3980_vm0, %v3979_v0 }
  0xf6   : > { %3591 = vmatmul.mubr.msk.f32.vlgmr.msra.gmra.mxu1 %vm345_vm1, %v565_v18  ;;  %3598 = vmatmul.mubr.msk.f32.vlgmr.msra.gmra.mxu0 %vm345_vm1, %v415_v12 }
  0xf7   : > { %3600 = vmatprep.subr.mxu1 %v3979_v0  ;;  %3607 = vmatprep.subr.mxu0 %v3979_v0  ;;  %v3571_v21 = vpop.f32.mrf.mxu0 }
  0xf8   : > { %3601 = vmatpush3.msra.mxu1 %v3338_v19  ;;  %3608 = vmatpush3.msra.mxu0 %v3341_v20  ;;  %v1490_v20 = vstv %s3362_s22  ;;  %s3440_s22 = sshll.u32 %s4051_s9, 10 }
  0xf9   : > { %3602 = vmatprep.subr.mxu1 %v3979_v0  ;;  %3609 = vmatprep.subr.mxu0 %v3979_v0  ;;  %s4500_s13 = scalar_lea.hbm %s4591_s7, %s3440_s22 }
  0xfa   : > { %3603 = vmatpush3.msra.mxu1 %v3337_v22  ;;  %3604 = vmatprep.mubr.msk.f32.mxu1 %vm3980_vm0, %v3979_v0 }
  0xfb   : > { %3610 = vmatpush3.msra.mxu0 %v3340_v23  ;;  %3611 = vmatprep.mubr.msk.f32.mxu0 %vm3980_vm0, %v3979_v0 }
  0xfc   : > { %3605 = vmatmul.mubr.msk.f32.vlgmr.msra.gmra.mxu1 %vm345_vm1, %v490_v13  ;;  %3612 = vmatmul.mubr.msk.f32.vlgmr.msra.gmra.mxu0 %vm345_vm1, %v565_v18 }
  0xfd   : > { %3614 = vmatprep.subr.mxu1 %v3979_v0  ;;  %3621 = vmatprep.subr.mxu0 %v3979_v0 }
  0xfe   : > { %3615 = vmatpush3.msra.mxu1 %v3345_v24  ;;  %3622 = vmatpush3.msra.mxu0 %v3345_v24 }
  0xff   : > { %3616 = vmatprep.subr.mxu1 %v3979_v0  ;;  %3623 = vmatprep.subr.mxu0 %v3979_v0 }
 0x100   : > { %3617 = vmatpush3.msra.mxu1 %v3344_v25  ;;  %3618 = vmatprep.mubr.msk.f32.mxu1 %vm3980_vm0, %v3979_v0 }
 0x101   : > { %3624 = vmatpush3.msra.mxu0 %v3344_v25  ;;  %3625 = vmatprep.mubr.msk.f32.mxu0 %vm3980_vm0, %v3979_v0 }
 0x102   : > { %3619 = vmatmul.mubr.msk.f32.vlgmr.msra.gmra.mxu1 %vm345_vm1, %v4117_v3  ;;  %3626 = vmatmul.mubr.msk.f32.vlgmr.msra.gmra.mxu0 %vm345_vm1, %v4122_v4 }
 0x103   : > { %3628 = vmatprep.subr.mxu1 %v3979_v0  ;;  %3632 = vmatprep.mubr.msk.f32.mxu1 %vm3980_vm0, %v3979_v0 }
 0x104   : > { %3629 = vmatpush3.msra.mxu1 %v3345_v24  ;;  %3635 = vmatprep.subr.mxu0 %v3979_v0 }
 0x105   : > { %3630 = vmatprep.subr.mxu1 %v3979_v0  ;;  %3639 = vmatprep.mubr.msk.f32.mxu0 %vm3980_vm0, %v3979_v0 }
 0x106   : > { %3631 = vmatpush3.msra.mxu1 %v3344_v25  ;;  %3636 = vmatpush3.msra.mxu0 %v3353_v26 }
 0x107   : > { %3633 = vmatmul.mubr.msk.f32.vlgmr.msra.gmra.mxu1 %vm345_vm1, %v4139_v6  ;;  %3642 = vmatprep.subr.mxu1 %v3979_v0 }
 0x108   : > { %3646 = vmatprep.mubr.msk.f32.mxu1 %vm3980_vm0, %v3979_v0  ;;  %3643 = vmatpush3.msra.mxu1 %v3356_v27 }
 0x109   : > { %3637 = vmatprep.subr.mxu0 %v3979_v0  ;;  %3644 = vmatprep.subr.mxu1 %v3979_v0 }
 0x10a   : > { %3638 = vmatpush3.msra.mxu0 %v3352_v28  ;;  %3645 = vmatpush3.msra.mxu1 %v3355_v29 }
 0x10b   : > { %3649 = vmatprep.subr.mxu0 %v3979_v0  ;;  %3656 = vmatprep.subr.mxu1 %v3979_v0 }
 0x1b1   : > { %v642_v31 = vpop.f32.mrf.mxu1  ;;  %v719_v32 = vpop.f32.mrf.mxu0 }
 0x1b2   : > { %v646_v33 = vadd.f32 %v642_v31, %v570_v30  ;;  %v3388_v30 = vld [vmem:[%s4586_s2 + $0xe8] sm:$0xff]  ;;  %v3393_v31 = vld [vmem:[%s4586_s2 + $0xf8] sm:$0xff] }
 0x1b3   : > { %v3578_v34 = vpop.f32.mrf.mxu1  ;;  %v3585_v35 = vpop.f32.mrf.mxu0 }
 0x1b4   : > { %v723_v36 = vadd.f32 %v719_v32, %v646_v33  ;;  %v3387_v34 = vld [vmem:[%s4586_s2 + $0xe0] sm:$0xff] }
 0x1b6   : > { %v796_v37 = vpop.f32.mrf.mxu1  ;;  %v874_v38 = vpop.f32.mrf.mxu0 }
 0x1b7   : > { %v800_v39 = vadd.f32 %v796_v37, %v723_v36  ;;  %v878_v43 = vadd.f32 %v874_v38, %v804_v40  ;;  %v3392_v36 = vld [vmem:[%s4586_s2 + $0xf0] sm:$0xff]  ;;  %v3399_v40 = vld [vmem:[%s4586_s2 + $0x118] sm:$0xff] }
 0x1b8   : > { %v3592_v41 = vpop.f32.mrf.mxu1  ;;  %v3599_v42 = vpop.f32.mrf.mxu0 }
 0x1b9   : > { %802 = vst.msk [vmem:[%s4253_s25] sm:$0xff] %vm801_vm2, %v800_v39  ;;  %v3396_v39 = vld [vmem:[%s4586_s2 + $0x108] sm:$0xff]  ;;  %v3395_v42 = vld [vmem:[%s4586_s2 + $0x100] sm:$0xff] }
 0x1bc   : > { %v948_v44 = vpop.f32.mrf.mxu1  ;;  %v1022_v45 = vpop.f32.mrf.mxu0 }
 0x1bd   : > { %v952_v46 = vadd.f32 %v948_v44, %v878_v43  ;;  %v3398_v43 = vld [vmem:[%s4586_s2 + $0x110] sm:$0xff]  ;;  %v3403_v44 = vld [vmem:[%s4110_s10 + $0x38] sm:$0xff] }
 0x1be   : > { %v3606_v47 = vpop.f32.mrf.mxu1  ;;  %v3613_v48 = vpop.f32.mrf.mxu0 }
 0x1bf   : > { %v1026_v49 = vadd.f32 %v1022_v45, %v952_v46  ;;  %v3402_v45 = vld [vmem:[%s4110_s10 + $0x30] sm:$0xff]  ;;  %v1941_v47 = vstv %s3380_s18  ;;  %s341_s18 = scalar_lea.vmem %s4588_s4, %s4100_s23  ;;  %s3409_s23 = sld [smem:[#allocation2 + $0x6]] }
 0x1c0   : > { %v3413_v46 = vld [vmem:[%s4586_s2 + $0x130] sm:$0xff]  ;;  %s4593_s10 = scalar_lea.vmem [#allocation6], %s4250_s21 }
 0x1c1   : > { %3343 = vst.msk [vmem:[%s4253_s25 + $0x8] sm:$0xff] %vm801_vm2, %v1026_v49 }
 0x1c2   : > { %v1102_v52 = vpop.f32.mrf.mxu1  ;;  %v1176_v53 = vpop.f32.mrf.mxu0 }
 0x1c3   : > { %3640 = vmatmul.mubr.msk.f32.vlgmr.msra.gmra.mxu0 %vm345_vm1, %v1102_v52  ;;  %3647 = vmatmul.mubr.msk.f32.vlgmr.msra.gmra.mxu1 %vm345_vm1, %v1176_v53 }
 0x1c4   : > { %v3620_v55 = vpop.f32.mrf.mxu1  ;;  %3650 = vmatpush3.msra.mxu0 %v3359_v50  ;;  %3657 = vmatpush3.msra.mxu1 %v3364_v51  ;;  %v3627_v57 = vpop.f32.mrf.mxu0 }
 0x1c5   : > { %3651 = vmatprep.subr.mxu0 %v3979_v0  ;;  %3658 = vmatprep.subr.mxu1 %v3979_v0  ;;  %v2176_v57 = vstv %s3391_s19  ;;  %s3436_s19 = sshll.u32 %s4051_s9, 4  ;;  %s3882_s9 = scalar_lea.vmem %s4502_s24, 1024 }
 0x1c6   : > { %3652 = vmatpush3.msra.mxu0 %v3358_v54  ;;  %3653 = vmatprep.mubr.msk.f32.mxu0 %vm3980_vm0, %v3979_v0  ;;  %s4516_s26 = scalar_lea.hbm %s4592_s8, %s3436_s19  ;;  %p3883_p9 = scmp.ne.s32.totalorder %s4502_s24, %s3882_s9 }
 0x1c7   : > { %v1250_v58 = vpop.f32.mrf.mxu1  ;;  %3659 = vmatpush3.msra.mxu1 %v3363_v56  ;;  %3660 = vmatprep.mubr.msk.f32.mxu1 %vm3980_vm0, %v3979_v0 }
 0x1c8   : > { %3654 = vmatmul.mubr.msk.f32.vlgmr.msra.gmra.mxu0 %vm345_vm1, %v1250_v58  ;;  %3661 = vmatmul.mubr.msk.f32.vlgmr.msra.gmra.mxu1 %vm345_vm1, %v1102_v52  ;;  %p3884_p10 = pnand %p3883_p9, %p4068_p5 }
 0x1c9   : > { %3663 = vmatprep.subr.mxu0 %v3979_v0  ;;  %3670 = vmatprep.subr.mxu1 %v3979_v0  ;;  %v3634_v61 = vpop.f32.mrf.mxu1 }
 0x1ca   : > { %3664 = vmatpush3.msra.mxu0 %v3367_v59  ;;  %3671 = vmatpush3.msra.mxu1 %v3370_v60  ;;  %p3885_p12 = pneg %p3884_p10 }
 0x1cb   : > { %3665 = vmatprep.subr.mxu0 %v3979_v0  ;;  %3672 = vmatprep.subr.mxu1 %v3979_v0 }
 0x1cc   : > { %3666 = vmatpush3.msra.mxu0 %v3366_v62  ;;  %3667 = vmatprep.mubr.msk.f32.mxu0 %vm3980_vm0, %v3979_v0 }
 0x1cd   : > { %3673 = vmatpush3.msra.mxu1 %v3369_v63  ;;  %3674 = vmatprep.mubr.msk.f32.mxu1 %vm3980_vm0, %v3979_v0 }
 0x1ce   : > { %3668 = vmatmul.mubr.msk.f32.vlgmr.msra.gmra.mxu0 %vm345_vm1, %v1176_v53  ;;  %3675 = vmatmul.mubr.msk.f32.vlgmr.msra.gmra.mxu1 %vm345_vm1, %v1250_v58 }
 0x1cf   : > { %3677 = vmatprep.subr.mxu0 %v3979_v0  ;;  %3684 = vmatprep.subr.mxu1 %v3979_v0 }
 0x1d0   : > { %3678 = vmatpush3.msra.mxu0 %v3374_v1  ;;  %3685 = vmatpush3.msra.mxu1 %v3374_v1 }
 0x1d1   : > { %3679 = vmatprep.subr.mxu0 %v3979_v0  ;;  %3686 = vmatprep.subr.mxu1 %v3979_v0 }
 0x1d2   : > { %3680 = vmatpush3.msra.mxu0 %v3373_v2  ;;  %3681 = vmatprep.mubr.msk.f32.mxu0 %vm3980_vm0, %v3979_v0 }
 0x1d3   : > { %3687 = vmatpush3.msra.mxu1 %v3373_v2  ;;  %3688 = vmatprep.mubr.msk.f32.mxu1 %vm3980_vm0, %v3979_v0 }
 0x1d4   : > { %3682 = vmatmul.mubr.msk.f32.vlgmr.msra.gmra.mxu0 %vm345_vm1, %v4117_v3  ;;  %3689 = vmatmul.mubr.msk.f32.vlgmr.msra.gmra.mxu1 %vm345_vm1, %v4122_v4 }
 0x1d5   : > { %3691 = vmatprep.subr.mxu0 %v3979_v0  ;;  %3695 = vmatprep.mubr.msk.f32.mxu0 %vm3980_vm0, %v3979_v0 }
 0x1d6   : > { %3692 = vmatpush3.msra.mxu0 %v3374_v1  ;;  %3698 = vmatprep.subr.mxu1 %v3979_v0 }
 0x1d7   : > { %3693 = vmatprep.subr.mxu0 %v3979_v0  ;;  %3702 = vmatprep.mubr.msk.f32.mxu1 %vm3980_vm0, %v3979_v0 }
 0x1d8   : > { %3694 = vmatpush3.msra.mxu0 %v3373_v2  ;;  %3699 = vmatpush3.msra.mxu1 %v3382_v5 }
 0x1d9   : > { %3696 = vmatmul.mubr.msk.f32.vlgmr.msra.gmra.mxu0 %vm345_vm1, %v4139_v6  ;;  %3705 = vmatprep.subr.mxu0 %v3979_v0 }
 0x1da   : > { %3709 = vmatprep.mubr.msk.f32.mxu0 %vm3980_vm0, %v3979_v0  ;;  %3706 = vmatpush3.msra.mxu0 %v3385_v7  ;;  %v3417_v7 = vld [vmem:[%s4586_s2 + $0x148] sm:$0xff] }
 0x1db   : > { %3700 = vmatprep.subr.mxu1 %v3979_v0  ;;  %3707 = vmatprep.subr.mxu0 %v3979_v0 }
 0x1dc   : > { %3701 = vmatpush3.msra.mxu1 %v3381_v8  ;;  %3708 = vmatpush3.msra.mxu0 %v3384_v9  ;;  %v3422_v8 = vld [vmem:[%s4586_s2 + $0x158] sm:$0xff] }
 0x1dd   : > { %3712 = vmatprep.subr.mxu1 %v3979_v0  ;;  %3719 = vmatprep.subr.mxu0 %v3979_v0 }
 0x283   : > { %v1328_v11 = vpop.f32.mrf.mxu0  ;;  %v1405_v12 = vpop.f32.mrf.mxu1 }
 0x284   : > { %v1332_v13 = vadd.f32 %v1328_v11, %v1255_v10  ;;  %v3416_v11 = vld [vmem:[%s4586_s2 + $0x140] sm:$0xff] }
 0x285   : > { %v3641_v14 = vpop.f32.mrf.mxu0  ;;  %v3648_v15 = vpop.f32.mrf.mxu1 }
 0x286   : > { %v1409_v16 = vadd.f32 %v1405_v12, %v1332_v13  ;;  %v3421_v13 = vld [vmem:[%s4586_s2 + $0x150] sm:$0xff] }
 0x288   : > { %v1482_v17 = vpop.f32.mrf.mxu0  ;;  %v1560_v18 = vpop.f32.mrf.mxu1 }
 0x289   : > { %v1486_v19 = vadd.f32 %v1482_v17, %v1409_v16  ;;  %v1564_v23 = vadd.f32 %v1560_v18, %v1490_v20  ;;  %v3425_v16 = vld [vmem:[%s4586_s2 + $0x168] sm:$0xff]  ;;  %v3428_v17 = vld [vmem:[%s4586_s2 + $0x178] sm:$0xff]  ;;  %v3427_v20 = vld [vmem:[%s4586_s2 + $0x170] sm:$0xff] }
 0x28a   : > { %v3655_v21 = vpop.f32.mrf.mxu0  ;;  %v3662_v22 = vpop.f32.mrf.mxu1 }
 0x28b   : > { %3361 = vst.msk [vmem:[%s4253_s25 + $0x10] sm:$0xff] %vm801_vm2, %v1486_v19  ;;  %v3424_v19 = vld [vmem:[%s4586_s2 + $0x160] sm:$0xff] }
 0x28c   : > { %v3088_v21 = vld [vmem:[%s4589_s5] sm:$0xf] }
 0x28d   : > { %v3087_v22 = vld [vmem:[%s341_s18] sm:$0x1]  ;;  %s3886_s18 = sshll.u32 %s3981_s17, 4  ;;  %s3887_s18 = int_to_ptr.vmem [resolvable:$false] %s3886_s18 }
 0x28e   : > { %v1634_v24 = vpop.f32.mrf.mxu0  ;;  %v1708_v25 = vpop.f32.mrf.mxu1  ;;  %p3889_p13 = scmp.lt.s32.totalorder %s4502_s24, %s3887_s18 }
 0x28f   : > { %v1638_v26 = vadd.f32 %v1634_v24, %v1564_v23  ;;  %v2627_v23 = vstv %s3409_s23  ;;  %s3204_s23 = sshll.u32 %s4593_s10, 4  ;;  %s3888_s10 = scalar_lea.vmem %s3887_s18, 2048  ;;  %s4518_s23 = int_to_ptr.vmem [resolvable:$true] %s3204_s23 }
 0x290   : > { %v3669_v27 = vpop.f32.mrf.mxu0  ;;  %v3676_v28 = vpop.f32.mrf.mxu1  ;;  %p3890_p0 = scmp.lt.s32.totalorder %s3888_s10, %s3882_s9 }
 0x291   : > { %v1712_v29 = vadd.f32 %v1708_v25, %v1638_v26 }
 0x292   : > { %p3891_p1 = por %p3890_p0, %p3889_p13 }
 0x293   : > { %3372 = vst.msk [vmem:[%s4253_s25 + $0x18] sm:$0xff] %vm801_vm2, %v1712_v29 }
 0x294   : > { %v1788_v32 = vpop.f32.mrf.mxu0  ;;  %v1862_v33 = vpop.f32.mrf.mxu1  ;;  %p3892_p2 = pnand %p3891_p1, %p3885_p12 }
 0x295   : > { %3703 = vmatmul.mubr.msk.f32.vlgmr.msra.gmra.mxu1 %vm345_vm1, %v1788_v32  ;;  %3710 = vmatmul.mubr.msk.f32.vlgmr.msra.gmra.mxu0 %vm345_vm1, %v1862_v33 }
 0x296   : > { %v3683_v35 = vpop.f32.mrf.mxu0  ;;  %3713 = vmatpush3.msra.mxu1 %v3388_v30  ;;  %3720 = vmatpush3.msra.mxu0 %v3393_v31  ;;  %v3690_v37 = vpop.f32.mrf.mxu1 }
 0x297   : > { %3714 = vmatprep.subr.mxu1 %v3979_v0  ;;  %3721 = vmatprep.subr.mxu0 %v3979_v0 }
 0x298   : > { %3715 = vmatpush3.msra.mxu1 %v3387_v34  ;;  %3716 = vmatprep.mubr.msk.f32.mxu1 %vm3980_vm0, %v3979_v0 }
 0x299   : > { %v1936_v38 = vpop.f32.mrf.mxu0  ;;  %3722 = vmatpush3.msra.mxu0 %v3392_v36  ;;  %3723 = vmatprep.mubr.msk.f32.mxu0 %vm3980_vm0, %v3979_v0 }
 0x29a   : > { %3717 = vmatmul.mubr.msk.f32.vlgmr.msra.gmra.mxu1 %vm345_vm1, %v1936_v38  ;;  %3724 = vmatmul.mubr.msk.f32.vlgmr.msra.gmra.mxu0 %vm345_vm1, %v1788_v32 }
 0x29b   : > { %3726 = vmatprep.subr.mxu1 %v3979_v0  ;;  %3733 = vmatprep.subr.mxu0 %v3979_v0  ;;  %v3697_v41 = vpop.f32.mrf.mxu0 }
 0x29c   : > { %3727 = vmatpush3.msra.mxu1 %v3396_v39  ;;  %3734 = vmatpush3.msra.mxu0 %v3399_v40  ;;  %v3089_v41 = vld [vmem:[%s4590_s6] sm:$0x1] }
 0x29d   : > { %3728 = vmatprep.subr.mxu1 %v3979_v0  ;;  %3735 = vmatprep.subr.mxu0 %v3979_v0 }
 0x29e   : > { %3729 = vmatpush3.msra.mxu1 %v3395_v42  ;;  %3730 = vmatprep.mubr.msk.f32.mxu1 %vm3980_vm0, %v3979_v0 }
 0x29f   : > { %3736 = vmatpush3.msra.mxu0 %v3398_v43  ;;  %3737 = vmatprep.mubr.msk.f32.mxu0 %vm3980_vm0, %v3979_v0 }
 0x2a0   : > { %3731 = vmatmul.mubr.msk.f32.vlgmr.msra.gmra.mxu1 %vm345_vm1, %v1862_v33  ;;  %3738 = vmatmul.mubr.msk.f32.vlgmr.msra.gmra.mxu0 %vm345_vm1, %v1936_v38 }
 0x2a1   : > { %3740 = vmatprep.subr.mxu1 %v3979_v0  ;;  %3747 = vmatprep.subr.mxu0 %v3979_v0 }
 0x2a2   : > { %3741 = vmatpush3.msra.mxu1 %v3403_v44  ;;  %3748 = vmatpush3.msra.mxu0 %v3403_v44 }
 0x2a3   : > { %3742 = vmatprep.subr.mxu1 %v3979_v0  ;;  %3749 = vmatprep.subr.mxu0 %v3979_v0 }
 0x2a4   : > { %3743 = vmatpush3.msra.mxu1 %v3402_v45  ;;  %3744 = vmatprep.mubr.msk.f32.mxu1 %vm3980_vm0, %v3979_v0 }
 0x2a5   : > { %3750 = vmatpush3.msra.mxu0 %v3402_v45  ;;  %3751 = vmatprep.mubr.msk.f32.mxu0 %vm3980_vm0, %v3979_v0 }
 0x2a6   : > { %3745 = vmatmul.mubr.msk.f32.vlgmr.msra.gmra.mxu1 %vm345_vm1, %v4117_v3  ;;  %3752 = vmatmul.mubr.msk.f32.vlgmr.msra.gmra.mxu0 %vm345_vm1, %v4122_v4  ;;  %v3411_v3 = vld [vmem:[%s4586_s2 + $0x128] sm:$0xff]  ;;  %v3414_v4 = vld [vmem:[%s4586_s2 + $0x138] sm:$0xff] }
 0x2a7   : > { %3754 = vmatprep.subr.mxu1 %v3979_v0  ;;  %3758 = vmatprep.mubr.msk.f32.mxu1 %vm3980_vm0, %v3979_v0 }
 0x2a8   : > { %3755 = vmatpush3.msra.mxu1 %v3403_v44  ;;  %3761 = vmatprep.subr.mxu0 %v3979_v0 }
 0x2a9   : > { %3756 = vmatprep.subr.mxu1 %v3979_v0  ;;  %3765 = vmatprep.mubr.msk.f32.mxu0 %vm3980_vm0, %v3979_v0 }
 0x2aa   : > { %3757 = vmatpush3.msra.mxu1 %v3402_v45  ;;  %3762 = vmatpush3.msra.mxu0 %v3411_v3 }
 0x2ab   : > { %3759 = vmatmul.mubr.msk.f32.vlgmr.msra.gmra.mxu1 %vm345_vm1, %v4139_v6  ;;  %3768 = vmatprep.subr.mxu1 %v3979_v0  ;;  %v3410_v6 = vld [vmem:[%s4586_s2 + $0x120] sm:$0xff] }
 0x2ac   : > { %3772 = vmatprep.mubr.msk.f32.mxu1 %vm3980_vm0, %v3979_v0  ;;  %3769 = vmatpush3.msra.mxu1 %v3414_v4 }
 0x2ad   : > { %3763 = vmatprep.subr.mxu0 %v3979_v0  ;;  %3770 = vmatprep.subr.mxu1 %v3979_v0 }
 0x2ae   : > { %3764 = vmatpush3.msra.mxu0 %v3410_v6  ;;  %3771 = vmatpush3.msra.mxu1 %v3413_v46 }
 0x2af   : > { %3775 = vmatprep.subr.mxu0 %v3979_v0  ;;  %3782 = vmatprep.subr.mxu1 %v3979_v0 }
 0x355   : > { %v2014_v48 = vpop.f32.mrf.mxu1  ;;  %v2091_v49 = vpop.f32.mrf.mxu0 }
 0x356   : > { %v2018_v50 = vadd.f32 %v2014_v48, %v1941_v47 }
 0x357   : > { %v3704_v51 = vpop.f32.mrf.mxu1  ;;  %v3711_v52 = vpop.f32.mrf.mxu0 }
 0x358   : > { %v2095_v53 = vadd.f32 %v2091_v49, %v2018_v50 }
 0x35a   : > { %v2168_v54 = vpop.f32.mrf.mxu1  ;;  %v2246_v55 = vpop.f32.mrf.mxu0 }
 0x35b   : > { %v2172_v56 = vadd.f32 %v2168_v54, %v2095_v53  ;;  %v2250_v60 = vadd.f32 %v2246_v55, %v2176_v57 }
 0x35c   : > { %v3718_v58 = vpop.f32.mrf.mxu1  ;;  %v3725_v59 = vpop.f32.mrf.mxu0 }
 0x35d   : > { %3390 = vst.msk [vmem:[%s4253_s25 + $0x20] sm:$0xff] %vm801_vm2, %v2172_v56 }
 0x360   : > { %v2320_v61 = vpop.f32.mrf.mxu1  ;;  %v2394_v62 = vpop.f32.mrf.mxu0 }
 0x361   : > { %v2324_v63 = vadd.f32 %v2320_v61, %v2250_v60 }
 0x362   : > { %v3732_v1 = vpop.f32.mrf.mxu1  ;;  %v3739_v2 = vpop.f32.mrf.mxu0 }
 0x363   : > { %v2398_v5 = vadd.f32 %v2394_v62, %v2324_v63 }
 0x365   : > { %3401 = vst.msk [vmem:[%s4253_s25 + $0x28] sm:$0xff] %vm801_vm2, %v2398_v5 }
 0x366   : > { %v2474_v9 = vpop.f32.mrf.mxu1  ;;  %v2548_v10 = vpop.f32.mrf.mxu0 }
 0x367   : > { %3766 = vmatmul.mubr.msk.f32.vlgmr.msra.gmra.mxu0 %vm345_vm1, %v2474_v9  ;;  %3773 = vmatmul.mubr.msk.f32.vlgmr.msra.gmra.mxu1 %vm345_vm1, %v2548_v10 }
 0x368   : > { %v3746_v12 = vpop.f32.mrf.mxu1  ;;  %3776 = vmatpush3.msra.mxu0 %v3417_v7  ;;  %3783 = vmatpush3.msra.mxu1 %v3422_v8  ;;  %v3753_v14 = vpop.f32.mrf.mxu0 }
 0x369   : > { %3777 = vmatprep.subr.mxu0 %v3979_v0  ;;  %3784 = vmatprep.subr.mxu1 %v3979_v0 }
 0x36a   : > { %3778 = vmatpush3.msra.mxu0 %v3416_v11  ;;  %3779 = vmatprep.mubr.msk.f32.mxu0 %vm3980_vm0, %v3979_v0 }
 0x36b   : > { %v2622_v15 = vpop.f32.mrf.mxu1  ;;  %3785 = vmatpush3.msra.mxu1 %v3421_v13  ;;  %3786 = vmatprep.mubr.msk.f32.mxu1 %vm3980_vm0, %v3979_v0 }
 0x36c   : > { %3780 = vmatmul.mubr.msk.f32.vlgmr.msra.gmra.mxu0 %vm345_vm1, %v2622_v15  ;;  %3787 = vmatmul.mubr.msk.f32.vlgmr.msra.gmra.mxu1 %vm345_vm1, %v2474_v9 }
 0x36d   : > { %3789 = vmatprep.subr.mxu0 %v3979_v0  ;;  %3796 = vmatprep.subr.mxu1 %v3979_v0  ;;  %v3760_v18 = vpop.f32.mrf.mxu1 }
 0x36e   : > { %3790 = vmatpush3.msra.mxu0 %v3425_v16  ;;  %3797 = vmatpush3.msra.mxu1 %v3428_v17 }
 0x36f   : > { %3791 = vmatprep.subr.mxu0 %v3979_v0  ;;  %3798 = vmatprep.subr.mxu1 %v3979_v0 }
 0x370   : > { %3792 = vmatpush3.msra.mxu0 %v3424_v19  ;;  %3793 = vmatprep.mubr.msk.f32.mxu0 %vm3980_vm0, %v3979_v0 }
 0x371   : > { %3799 = vmatpush3.msra.mxu1 %v3427_v20  ;;  %3800 = vmatprep.mubr.msk.f32.mxu1 %vm3980_vm0, %v3979_v0 }
 0x372   : > { %3794 = vmatmul.mubr.msk.f32.vlgmr.msra.gmra.mxu0 %vm345_vm1, %v2548_v10  ;;  %3801 = vmatmul.mubr.msk.f32.vlgmr.msra.gmra.mxu1 %vm345_vm1, %v2622_v15 }
 0x373   : > { %3803 = vmatprep.subr.mxu0 %v3979_v0  ;;  %3805 = vmatprep.mubr.msk.f32.mxu0 %vm3980_vm0, %v3979_v0  ;;  %v2862_v0 = vstv %s3420_s20 }
 0x374   : > { %3804 = vmatpush3.msk.msra.mxu0 %vm3094_vm3, %v3088_v21 }
 0x376   : > { %3806 = vmatmul.mubr.msk.f32.vlgmr.msra.gmra.mxu0 %vm3090_vm4, %v3087_v22 }
 0x427   : > { %v2700_v24 = vpop.f32.mrf.mxu0  ;;  %v2777_v25 = vpop.f32.mrf.mxu1 }
 0x428   : > { %v2704_v26 = vadd.f32 %v2700_v24, %v2627_v23 }
 0x429   : > { %v3767_v27 = vpop.f32.mrf.mxu0  ;;  %v3774_v28 = vpop.f32.mrf.mxu1 }
 0x42a   : > { %v2781_v29 = vadd.f32 %v2777_v25, %v2704_v26 }
 0x42c   : > { %v2854_v30 = vpop.f32.mrf.mxu0  ;;  %v2932_v31 = vpop.f32.mrf.mxu1 }
 0x42d   : > { %v2858_v32 = vadd.f32 %v2854_v30, %v2781_v29  ;;  %v2936_v35 = vadd.f32 %v2932_v31, %v2862_v0 }
 0x42e   : > { %v3781_v33 = vpop.f32.mrf.mxu0  ;;  %v3788_v34 = vpop.f32.mrf.mxu1 }
 0x42f   : > { %3419 = vst.msk [vmem:[%s4253_s25 + $0x30] sm:$0xff] %vm801_vm2, %v2858_v32 }
 0x432   : > { %v3006_v36 = vpop.f32.mrf.mxu0  ;;  %v3080_v37 = vpop.f32.mrf.mxu1 }
 0x433   : > { %v3010_v38 = vadd.f32 %v3006_v36, %v2936_v35 }
 0x434   : > { %v3795_v39 = vpop.f32.mrf.mxu0  ;;  %v3802_v40 = vpop.f32.mrf.mxu1 }
 0x435   : > { %v3084_v42 = vadd.f32 %v3080_v37, %v3010_v38 }
 0x436   : > { %v3164_v43 = vpop.f32.mrf.mxu0 }
 0x437   : > { %3430 = vst.msk [vmem:[%s4253_s25 + $0x38] sm:$0xff] %vm801_vm2, %v3084_v42  ;;  %v3165_v44 = vadd.f32 %v3164_v43, %v3089_v41 }
 0x438   : > { %v3807_v45 = vpop.f32.mrf.mxu0 }
 0x439   : > { %3895 = shalt.err (!%p3892_p2)
}
 0x43a   : > { %s3896_s25 = scalar_lea.hbm %s4500_s13, 1024  ;;  %s3900_s22 = scalar_lea.hbm %s4591_s7, 2048 }
 0x43b   : > { %p3897_p3 = scmp.ne.s32.totalorder %s4500_s13, %s3896_s25  ;;  %p3901_p8 = scmp.lt.s32.totalorder %s4500_s13, %s4591_s7 }
 0x43c   : > { %p3902_p11 = scmp.lt.s32.totalorder %s3900_s22, %s3896_s25 }
 0x43d   : > { %p3898_p4 = pnand %p3897_p3, %p4068_p5 }
 0x43e   : > { %p3903_p9 = por %p3902_p11, %p3901_p8 }
 0x43f   : > { %p3899_p7 = pneg %p3898_p4 }
 0x441   : > { %p3904_p10 = pnand %p3903_p9, %p3899_p7 }
 0x443   : > { %3907 = shalt.err (!%p3904_p10)
}
 0x444   : > { %s3982_s10 = smov 128   ;;  %s3983_s9 = smov 8  }
 0x445   : > { %s4597_s18 = scalar_lea.sflag [#allocation3], %s4250_s21  ;;  %s4598_s12 = scalar_lea.vmem [#allocation6], %s4250_s21 }
 0x446   : > { %3812 = dma.vmem_to_hbm [thread:$0]  (%p4068_p5), %s4502_s24, 1024, %s4500_s13, %s4597_s18, %s3982_s10, %s3982_s10, %s3983_s9  }
 0x447   : > { %3169 = vst.msk [vmem:[%s4598_s12] sm:$0x1] %vm3168_vm5, %v3165_v44  ;;  %s3176_s25 = scalar_lea.sflag [#allocation7], %s4250_s21  ;;  %s3908_s19 = scalar_lea.vmem %s4518_s23, 16 }
 0x448   : > { %p3909_p12 = scmp.ne.s32.totalorder %s4518_s23, %s3908_s19  ;;  %s3984_s20 = smov [#allocation6]  }
 0x449   : > { %s3912_s22 = sshll.u32 %s3984_s20, 4  ;;  %s3913_s22 = int_to_ptr.vmem [resolvable:$false] %s3912_s22 }
 0x44a   : > { %p3910_p13 = pnand %p3909_p12, %p4068_p5  ;;  %s3914_s17 = scalar_lea.vmem %s3913_s22, 32 }
 0x44b   : > { %p3915_p1 = scmp.lt.s32.totalorder %s4518_s23, %s3913_s22  ;;  %p3916_p2 = scmp.lt.s32.totalorder %s3914_s17, %s3908_s19 }
 0x44c   : > { %p3911_p0 = pneg %p3910_p13 }
 0x44d   : > { %p3917_p3 = por %p3916_p2, %p3915_p1 }
 0x44f   : > { %p3918_p4 = pnand %p3917_p3, %p3911_p0 }
 0x451   : > { %3921 = shalt.err (!%p3918_p4)
}
 0x452   : > { %s3922_s24 = scalar_lea.hbm %s4516_s26, 16  ;;  %s3926_s10 = scalar_lea.hbm %s4592_s8, 32 }
 0x453   : > { %p3923_p7 = scmp.ne.s32.totalorder %s4516_s26, %s3922_s24  ;;  %p3927_p9 = scmp.lt.s32.totalorder %s4516_s26, %s4592_s8 }
 0x454   : > { %p3928_p10 = scmp.lt.s32.totalorder %s3926_s10, %s3922_s24 }
 0x455   : > { %p3924_p8 = pnand %p3923_p7, %p4068_p5 }
 0x456   : > { %p3929_p12 = por %p3928_p10, %p3927_p9 }
 0x457   : > { %p3925_p11 = pneg %p3924_p8 }
 0x459   : > { %p3930_p13 = pnand %p3929_p12, %p3925_p11 }
 0x45b   : > { %3933 = shalt.err (!%p3930_p13)
}
 0x45c   : > { %3813 = dma.vmem_to_hbm [thread:$0]  (%p4068_p5), %s4518_s23, 16, %s4516_s26, %s3176_s25  }
 0x45d PF: > { %p3829_p0 = scmp.ge.s32.totalorder %s3976_s30, 2  ;;  %s3216_s12 = sand.u32 1, %s3964_s27  }
 0x45e   : > { %s3217_s19 = scalar_lea.sflag [#allocation3], %s3216_s12 }
 0x45f   : > { %p3821_p1 = pnand %p3829_p0, %p4072_p6 }
 0x461   : > { %p3822_p2 = pneg %p3821_p1 }
 0x463   : > { %3955 = dma.done.wait (%p3822_p2), %s3217_s19, 1024  }
 0x464   : > { %3957 = vsyncadd (%p3822_p2), %s3217_s19, 4294966272  ;;  %s3226_s20 = scalar_lea.sflag [#allocation7], %s3216_s12 }
 0x465   : > { %3959 = dma.done.wait (%p3822_p2), %s3226_s20, 16  }
 0x466   : > { %3961 = vsyncadd (%p3822_p2), %s3226_s20, 4294967280  ;;  %p23_p5 = scmp.ge.s32.totalorder %s4055_s11, 4   ;;  %s4599_s27 = smov %s3968_s28 }
 0x467   : > { %s4600_s28 = smov %s3972_s29  ;;  %s4601_s29 = smov %s4066_s14 }
 0x468   : > { %s4602_s30 = smov %s4055_s11  ;;  %25 = sbr.rel (!%p23_p5) target bundleno = 6 (0x6), region = 143 }
 0x46d   :  { %3230 = vsyncpa [#allocation3], 1 }
 0x46e   :  { %3232 = vsyncpa [#allocation3 + $0x1], 1 }
 0x46f   :  { %3233 = vsyncpa [#allocation7], 1 }
 0x470   :  { %3235 = vsyncpa [#allocation7 + $0x1], 1 }
 0x471   :  { %3236 = vsyncpa [#allocation4], 1 }
 0x472   :  { %3238 = vsyncpa [#allocation4 + $0x1], 1 }

</bundles_post_ra>
